<compile_context>
chip_gen: v6e
topology: v6e:2x2x1
jax: 0.10.0
libtpu: 0.0.40
codegen_flags: <defaults>
</compile_context>

<pallas_src>
import jax
import jax.numpy as jnp
from jax.experimental import pallas as pl
from jax.experimental.pallas import tpu as pltpu

_K = 9          # conv taps
_PAD = 4        # "same" padding
_L = 50         # sequence length (and FC width)
_WSLAB = 64     # lanes per sample slab: 4 guard + 50 data + 10 guard
_GUARD = 4      # left guard lanes inside a slab
_ROWS = 24      # channel rows carried per layer (3 sublane tiles >= 20)
_BASE = 128     # left guard band (lanes) of the padded activation scratch
_B_TILE = 4     # samples per grid step -> 4 * 64 = 256 lanes (lane dense)


# ----------------------------------------------------------------------------
# Pallas kernel: whole forward pass (3 convs + FC head) for one batch tile.
# ----------------------------------------------------------------------------
def prognet_kernel(x_ref, wconv_ref, bias_ref, fc_ref, out_ref,
                   hpad_ref, im_ref):
    Wt = x_ref.shape[1]                      # _B_TILE * _WSLAB (= 256)
    btile = out_ref.shape[-1]

    # Zero only the lane guard bands of hpad; the interior is fully
    # overwritten below.  Done every step (cheap, and safe when the parallel
    # grid axis is split across TensorCores, since scratch is per-core).
    hpad_ref[:, 0:_BASE] = jnp.zeros((_ROWS, _BASE), jnp.float32)
    hpad_ref[:, _BASE + Wt:_BASE + Wt + 128] = jnp.zeros((_ROWS, 128),
                                                         jnp.float32)
    hpad_ref[:, _BASE:_BASE + Wt] = x_ref[...]          # full-height, lane-dense

    # Interior mask: 1.0 on the 50 data lanes of each 64-lane slab, 0.0 on the
    # guard lanes.  Built once in-kernel (no extra input DMA stream).
    lane = jax.lax.broadcasted_iota(jnp.int32, (1, Wt), 1)
    lmod = jnp.bitwise_and(lane, _WSLAB - 1)
    interior = jnp.where((lmod >= _GUARD) & (lmod < _GUARD + _L), 1.0, 0.0)

    def conv_relu(layer):
        hp = hpad_ref[...]                               # (24, _BASE + Wt + 128)
        for k in range(_K):                              # 9 aligned full-slab stores
            off = _BASE - _PAD + k
            im_ref[k * _ROWS:(k + 1) * _ROWS, :] = hp[:, off:off + Wt]
        w = wconv_ref[layer * _ROWS:(layer + 1) * _ROWS, :]     # (24, 216)
        b = bias_ref[layer * _ROWS:(layer + 1) * _ROWS, 0:1]    # (24, 1)
        acc = jnp.dot(w, im_ref[...],                    # (24,216)@(216,Wt)
                      preferred_element_type=jnp.float32)
        return jnp.maximum(acc + b, 0.0)                 # (24, Wt); rows>=Cout are 0

    h = conv_relu(0)
    hpad_ref[:, _BASE:_BASE + Wt] = h * interior         # re-zero slab guards
    h = conv_relu(1)
    hpad_ref[:, _BASE:_BASE + Wt] = h * interior
    h3 = conv_relu(2)                                    # row 0 = conv3 output

    # FC head on the flat (1, Wt) conv3 row via block-diagonal weights:
    # guard lanes of h3 multiply all-zero rows of W1big, so no regroup needed.
    fcw = fc_ref[...]                                    # (Wt, Wt + btile)
    b1 = bias_ref[_ROWS * 3:_ROWS * 3 + 1, :]            # (1, Wt)   tiled fb1
    b2 = bias_ref[_ROWS * 3 + 1:_ROWS * 3 + 2, 0:btile]  # (1, btile) fb2
    z = jnp.maximum(
        jnp.dot(h3[0:1, :], fcw[:, 0:Wt],
                preferred_element_type=jnp.float32) + b1, 0.0)   # (1, Wt)
    y = jnp.maximum(
        jnp.dot(z, fcw[:, Wt:Wt + btile],
                preferred_element_type=jnp.float32) + b2, 0.0)   # (1, btile)
    out_ref[0] = y.astype(out_ref.dtype)                 # single tiny store


# ----------------------------------------------------------------------------
# Wrapper: slab layout / parameter packing + pallas_call.
# ----------------------------------------------------------------------------
def prognet_forward(x, params, b_tile=_B_TILE):
    B, C, L = x.shape                       # NCL, matches PyTorch
    assert C == 18 and L == _L
    assert B % b_tile == 0
    ntiles = B // b_tile
    Wtile = b_tile * _WSLAB                 # lanes per grid step (256)
    hpad_w = _BASE + Wtile + 128

    # --- activations: per-sample 64-lane slabs, channels padded to 24 rows ---
    xt = jnp.transpose(x, (1, 0, 2)).astype(jnp.float32)           # (C, B, L)
    xt = jnp.pad(xt, ((0, _ROWS - C), (0, 0),
                      (_GUARD, _WSLAB - _GUARD - _L)))             # (24, B, 64)
    xslab = xt.reshape(_ROWS, B * _WSLAB)                          # (24, B*64)

    # --- conv weights packed to (72, 216): row = layer*24+o, col = k*24+cin ---
    def flatten_conv_w(w):
        cout, cin, k = w.shape
        wt = jnp.transpose(w, (2, 1, 0)).astype(jnp.float32)       # (K, cin, cout)
        wt = jnp.pad(wt, ((0, 0), (0, _ROWS - cin), (0, _ROWS - cout)))
        return wt.reshape(k * _ROWS, _ROWS).T                      # (24, 216)

    wconv = jnp.concatenate([flatten_conv_w(params["w1"]),
                             flatten_conv_w(params["w2"]),
                             flatten_conv_w(params["w3"])], axis=0)  # (72, 216)

    # --- bias pack (80, Wtile): rows 0..71 lane0 = conv biases (24 per layer),
    #     row 72 = per-slab-tiled fb1, row 73 lanes 0..b_tile = fb2 ---
    def pad_bias(b):
        return jnp.pad(b.astype(jnp.float32), (0, _ROWS - b.shape[0]))
    cb = jnp.concatenate([pad_bias(params["b1"]), pad_bias(params["b2"]),
                          pad_bias(params["b3"])])                   # (72,)
    b1row = jnp.tile(jnp.pad(params["fb1"].astype(jnp.float32),
                             (0, _WSLAB - _L)), b_tile)              # (Wtile,)
    bias_pack = jnp.zeros((80, Wtile), jnp.float32)
    bias_pack = bias_pack.at[0:72, 0].set(cb)
    bias_pack = bias_pack.at[72, :].set(b1row)
    bias_pack = bias_pack.at[73, 0:b_tile].set(
        jnp.broadcast_to(params["fb2"].astype(jnp.float32), (b_tile,)))

    # --- FC pack (Wtile, Wtile + b_tile): block-diagonal Linear(50,50) over
    #     the 64-lane slabs (input rows offset by the 4 guard lanes), then the
    #     block-diagonal Linear(50,1) columns appended on the right. ---
    blk = jnp.zeros((_WSLAB, _WSLAB), jnp.float32)
    blk = blk.at[_GUARD:_GUARD + _L, 0:_L].set(
        params["fw1"].astype(jnp.float32).T)                        # rows=in, cols=out
    w1big = jnp.kron(jnp.eye(b_tile, dtype=jnp.float32), blk)       # (Wtile, Wtile)
    col = jnp.zeros((_WSLAB, 1), jnp.float32)
    col = col.at[0:_L, 0].set(params["fw2"].astype(jnp.float32)[0])
    w2big = jnp.kron(jnp.eye(b_tile, dtype=jnp.float32), col)       # (Wtile, b_tile)
    fc_pack = jnp.concatenate([w1big, w2big], axis=1)               # (Wtile, Wtile+b)

    out = pl.pallas_call(
        prognet_kernel,
        out_shape=jax.ShapeDtypeStruct((ntiles, 1, b_tile), jnp.float32),
        grid_spec=pltpu.PrefetchScalarGridSpec(
            num_scalar_prefetch=0,
            grid=(ntiles,),
            in_specs=[
                pl.BlockSpec((_ROWS, Wtile), lambda i: (0, i)),          # x tile
                pl.BlockSpec((_ROWS * 3, _K * _ROWS), lambda i: (0, 0)),  # conv W (resident)
                pl.BlockSpec((80, Wtile), lambda i: (0, 0)),              # biases (resident)
                pl.BlockSpec((Wtile, Wtile + b_tile), lambda i: (0, 0)),  # FC pack (resident)
            ],
            out_specs=pl.BlockSpec((1, 1, b_tile), lambda i: (i, 0, 0)),
            scratch_shapes=[
                pltpu.VMEM((_ROWS, hpad_w), jnp.float32),     # padded activations
                pltpu.VMEM((_K * _ROWS, Wtile), jnp.float32),  # im2col
            ]),
        compiler_params=pltpu.CompilerParams(
            dimension_semantics=("parallel",)),
    )(xslab, wconv, bias_pack, fc_pack)

    return out.reshape(B, 1)


# ----------------------------------------------------------------------------
# Pure-JAX reference (mirrors the PyTorch forward) for a correctness check.
# ----------------------------------------------------------------------------
def ref_forward(x, p):
    def conv1d_relu(h, w, b):
        out = jax.lax.conv_general_dilated(
            h, w, window_strides=(1,), padding=[(4, 4)],
            dimension_numbers=("NCH", "OIH", "NCH"))
        return jax.nn.relu(out + b[None, :, None])

    h = conv1d_relu(x, p["w1"], p["b1"])
    h = conv1d_relu(h, p["w2"], p["b2"])
    h = conv1d_relu(h, p["w3"], p["b3"])
    h = h.reshape(x.shape[0], -1)                       # Flatten -> (B, 50)
    h = jax.nn.relu(h @ p["fw1"].T + p["fb1"])
    y = jax.nn.relu(h @ p["fw2"].T + p["fb2"])
    return y


if __name__ == "__main__":
    key = jax.random.PRNGKey(0)
    ks = jax.random.split(key, 11)

    B, Cin, L = 8, 18, 50                 # Linear(50, ...) forces L*1 == 50
    x = jax.random.normal(ks[0], (B, Cin, L), dtype=jnp.float32)

    params = {
        "w1": 0.1 * jax.random.normal(ks[1], (20, 18, 9), jnp.float32),
        "b1": 0.1 * jax.random.normal(ks[2], (20,), jnp.float32),
        "w2": 0.1 * jax.random.normal(ks[3], (20, 20, 9), jnp.float32),
        "b2": 0.1 * jax.random.normal(ks[4], (20,), jnp.float32),
        "w3": 0.1 * jax.random.normal(ks[5], (1, 20, 9), jnp.float32),
        "b3": 0.1 * jax.random.normal(ks[6], (1,), jnp.float32),
        "fw1": 0.1 * jax.random.normal(ks[7], (50, 50), jnp.float32),
        "fb1": 0.1 * jax.random.normal(ks[8], (50,), jnp.float32),
        "fw2": 0.1 * jax.random.normal(ks[9], (1, 50), jnp.float32),
        "fb2": 0.1 * jax.random.normal(ks[10], (1,), jnp.float32),
    }

    out = prognet_forward(x, params)
    out = jax.block_until_ready(out)

    ref = ref_forward(x, params)
    assert out.shape == (B, 1), out.shape
    assert bool(jnp.allclose(out, ref, rtol=1e-4, atol=1e-4)), (
        "mismatch", float(jnp.max(jnp.abs(out - ref))))

    print("KERNEL_OK")
</pallas_src>

<mosaic_0001>
module attributes {stable_mosaic.version = 11 : i64} {
  func.func @prognet_kernel(%arg0: i32, %arg1: memref<24x256xf32, #tpu.memory_space<vmem>>, %arg2: memref<72x216xf32, #tpu.memory_space<vmem>>, %arg3: memref<80x256xf32, #tpu.memory_space<vmem>>, %arg4: memref<256x260xf32, #tpu.memory_space<vmem>>, %arg5: memref<1x1x4xf32, #tpu.memory_space<vmem>>, %arg6: memref<24x512xf32, #tpu.memory_space<vmem>>, %arg7: memref<216x256xf32, #tpu.memory_space<vmem>>) attributes {dimension_semantics = [#tpu.dimension_semantics<parallel>], iteration_bounds = array<i64: 2>, scalar_prefetch = 0 : i64, scratch_operands = 2 : i64, tpu.core_type = #tpu.core_type<tc>, window_params = [{transform_indices = @transform_0, window_bounds = array<i64: 24, 256>}, {pipeline_mode = #tpu.pipeline_mode<synchronous>, transform_indices = @transform_1, window_bounds = array<i64: 72, 216>}, {pipeline_mode = #tpu.pipeline_mode<synchronous>, transform_indices = @transform_2, window_bounds = array<i64: 80, 256>}, {pipeline_mode = #tpu.pipeline_mode<synchronous>, transform_indices = @transform_3, window_bounds = array<i64: 256, 260>}, {transform_indices = @transform_4, window_bounds = array<i64: 1, 1, 4>}]} {
    %cst = arith.constant 0.000000e+00 : f32
    %0 = vector.broadcast %cst : f32 to vector<24x128xf32>
    %c0 = arith.constant 0 : index
    %c0_0 = arith.constant 0 : index
    %1 = vector.load %arg6[%c0, %c0_0] : memref<24x512xf32, #tpu.memory_space<vmem>>, vector<24x128xf32>
    tpu.vector_store %arg6[%c0, %c0_0], %0 {strides = array<i32>} : memref<24x512xf32, #tpu.memory_space<vmem>>, vector<24x128xf32>,
    %cst_1 = arith.constant 0.000000e+00 : f32
    %2 = vector.broadcast %cst_1 : f32 to vector<24x128xf32>
    %c0_2 = arith.constant 0 : index
    %c384 = arith.constant 384 : index
    %3 = vector.load %arg6[%c0_2, %c384] : memref<24x512xf32, #tpu.memory_space<vmem>>, vector<24x128xf32>
    tpu.vector_store %arg6[%c0_2, %c384], %2 {strides = array<i32>} : memref<24x512xf32, #tpu.memory_space<vmem>>, vector<24x128xf32>,
    %c0_3 = arith.constant 0 : index
    %c0_4 = arith.constant 0 : index
    %4 = vector.load %arg1[%c0_3, %c0_4] : memref<24x256xf32, #tpu.memory_space<vmem>>, vector<24x256xf32>
    %c0_5 = arith.constant 0 : index
    %c128 = arith.constant 128 : index
    %5 = vector.load %arg6[%c0_5, %c128] : memref<24x512xf32, #tpu.memory_space<vmem>>, vector<24x256xf32>
    tpu.vector_store %arg6[%c0_5, %c128], %4 {strides = array<i32>} : memref<24x512xf32, #tpu.memory_space<vmem>>, vector<24x256xf32>,
    %6 = tpu.iota {dimensions = array<i32: 1>} : vector<1x256xi32>
    %c63_i32 = arith.constant 63 : i32
    %7 = vector.broadcast %c63_i32 : i32 to vector<1x256xi32>
    %8 = arith.andi %6, %7 : vector<1x256xi32>
    %c4_i32 = arith.constant 4 : i32
    %9 = vector.broadcast %c4_i32 : i32 to vector<1x256xi32>
    %10 = arith.cmpi sge, %8, %9 : vector<1x256xi32>
    %c54_i32 = arith.constant 54 : i32
    %11 = vector.broadcast %c54_i32 : i32 to vector<1x256xi32>
    %12 = arith.cmpi slt, %8, %11 : vector<1x256xi32>
    %13 = arith.andi %10, %12 : vector<1x256xi1>
    %cst_6 = arith.constant 1.000000e+00 : f32
    %cst_7 = arith.constant 0.000000e+00 : f32
    %14 = vector.broadcast %cst_6 : f32 to vector<1x256xf32>
    %15 = vector.broadcast %cst_7 : f32 to vector<1x256xf32>
    %16 = arith.select %13, %14, %15 : vector<1x256xi1>, vector<1x256xf32>
    %c0_8 = arith.constant 0 : index
    %c0_9 = arith.constant 0 : index
    %17 = vector.load %arg6[%c0_8, %c0_9] : memref<24x512xf32, #tpu.memory_space<vmem>>, vector<24x512xf32>
    %18 = vector.extract_strided_slice %17 {offsets = [0, 124], sizes = [24, 256], strides = [1, 1]} : vector<24x512xf32> to vector<24x256xf32>
    %c0_10 = arith.constant 0 : index
    %c0_11 = arith.constant 0 : index
    %19 = vector.load %arg7[%c0_10, %c0_11] : memref<216x256xf32, #tpu.memory_space<vmem>>, vector<24x256xf32>
    tpu.vector_store %arg7[%c0_10, %c0_11], %18 {strides = array<i32>} : memref<216x256xf32, #tpu.memory_space<vmem>>, vector<24x256xf32>,
    %20 = vector.extract_strided_slice %17 {offsets = [0, 125], sizes = [24, 256], strides = [1, 1]} : vector<24x512xf32> to vector<24x256xf32>
    %c24 = arith.constant 24 : index
    %c0_12 = arith.constant 0 : index
    %21 = vector.load %arg7[%c24, %c0_12] : memref<216x256xf32, #tpu.memory_space<vmem>>, vector<24x256xf32>
    tpu.vector_store %arg7[%c24, %c0_12], %20 {strides = array<i32>} : memref<216x256xf32, #tpu.memory_space<vmem>>, vector<24x256xf32>,
    %22 = vector.extract_strided_slice %17 {offsets = [0, 126], sizes = [24, 256], strides = [1, 1]} : vector<24x512xf32> to vector<24x256xf32>
    %c48 = arith.constant 48 : index
    %c0_13 = arith.constant 0 : index
    %23 = vector.load %arg7[%c48, %c0_13] : memref<216x256xf32, #tpu.memory_space<vmem>>, vector<24x256xf32>
    tpu.vector_store %arg7[%c48, %c0_13], %22 {strides = array<i32>} : memref<216x256xf32, #tpu.memory_space<vmem>>, vector<24x256xf32>,
    %24 = vector.extract_strided_slice %17 {offsets = [0, 127], sizes = [24, 256], strides = [1, 1]} : vector<24x512xf32> to vector<24x256xf32>
    %c72 = arith.constant 72 : index
    %c0_14 = arith.constant 0 : index
    %25 = vector.load %arg7[%c72, %c0_14] : memref<216x256xf32, #tpu.memory_space<vmem>>, vector<24x256xf32>
    tpu.vector_store %arg7[%c72, %c0_14], %24 {strides = array<i32>} : memref<216x256xf32, #tpu.memory_space<vmem>>, vector<24x256xf32>,
    %26 = vector.extract_strided_slice %17 {offsets = [0, 128], sizes = [24, 256], strides = [1, 1]} : vector<24x512xf32> to vector<24x256xf32>
    %c96 = arith.constant 96 : index
    %c0_15 = arith.constant 0 : index
    %27 = vector.load %arg7[%c96, %c0_15] : memref<216x256xf32, #tpu.memory_space<vmem>>, vector<24x256xf32>
    tpu.vector_store %arg7[%c96, %c0_15], %26 {strides = array<i32>} : memref<216x256xf32, #tpu.memory_space<vmem>>, vector<24x256xf32>,
    %28 = vector.extract_strided_slice %17 {offsets = [0, 129], sizes = [24, 256], strides = [1, 1]} : vector<24x512xf32> to vector<24x256xf32>
    %c120 = arith.constant 120 : index
    %c0_16 = arith.constant 0 : index
    %29 = vector.load %arg7[%c120, %c0_16] : memref<216x256xf32, #tpu.memory_space<vmem>>, vector<24x256xf32>
    tpu.vector_store %arg7[%c120, %c0_16], %28 {strides = array<i32>} : memref<216x256xf32, #tpu.memory_space<vmem>>, vector<24x256xf32>,
    %30 = vector.extract_strided_slice %17 {offsets = [0, 130], sizes = [24, 256], strides = [1, 1]} : vector<24x512xf32> to vector<24x256xf32>
    %c144 = arith.constant 144 : index
    %c0_17 = arith.constant 0 : index
    %31 = vector.load %arg7[%c144, %c0_17] : memref<216x256xf32, #tpu.memory_space<vmem>>, vector<24x256xf32>
    tpu.vector_store %arg7[%c144, %c0_17], %30 {strides = array<i32>} : memref<216x256xf32, #tpu.memory_space<vmem>>, vector<24x256xf32>,
    %32 = vector.extract_strided_slice %17 {offsets = [0, 131], sizes = [24, 256], strides = [1, 1]} : vector<24x512xf32> to vector<24x256xf32>
    %c168 = arith.constant 168 : index
    %c0_18 = arith.constant 0 : index
    %33 = vector.load %arg7[%c168, %c0_18] : memref<216x256xf32, #tpu.memory_space<vmem>>, vector<24x256xf32>
    tpu.vector_store %arg7[%c168, %c0_18], %32 {strides = array<i32>} : memref<216x256xf32, #tpu.memory_space<vmem>>, vector<24x256xf32>,
    %34 = vector.extract_strided_slice %17 {offsets = [0, 132], sizes = [24, 256], strides = [1, 1]} : vector<24x512xf32> to vector<24x256xf32>
    %c192 = arith.constant 192 : index
    %c0_19 = arith.constant 0 : index
    %35 = vector.load %arg7[%c192, %c0_19] : memref<216x256xf32, #tpu.memory_space<vmem>>, vector<24x256xf32>
    tpu.vector_store %arg7[%c192, %c0_19], %34 {strides = array<i32>} : memref<216x256xf32, #tpu.memory_space<vmem>>, vector<24x256xf32>,
    %c0_20 = arith.constant 0 : index
    %c0_21 = arith.constant 0 : index
    %36 = vector.load %arg2[%c0_20, %c0_21] : memref<72x216xf32, #tpu.memory_space<vmem>>, vector<24x216xf32>
    %c0_22 = arith.constant 0 : index
    %c0_23 = arith.constant 0 : index
    %37 = vector.load %arg3[%c0_22, %c0_23] : memref<80x256xf32, #tpu.memory_space<vmem>>, vector<24x1xf32>
    %c0_24 = arith.constant 0 : index
    %c0_25 = arith.constant 0 : index
    %38 = vector.load %arg7[%c0_24, %c0_25] : memref<216x256xf32, #tpu.memory_space<vmem>>, vector<216x256xf32>
    %cst_26 = arith.constant dense<0.000000e+00> : vector<24x256xf32>
    %39 = tpu.matmul %36, %38, %cst_26 {dimension_numbers = #tpu.dot_dimension_numbers<[1], [0], [0], [1], [0, 0, 1, 1], [], []>} : vector<24x216xf32>, vector<216x256xf32>, vector<24x256xf32> -> vector<24x256xf32>
    %40 = vector.broadcast %37 : vector<24x1xf32> to vector<24x256xf32>
    %41 = arith.addf %39, %40 : vector<24x256xf32>
    %cst_27 = arith.constant 0.000000e+00 : f32
    %42 = vector.broadcast %cst_27 : f32 to vector<24x256xf32>
    %43 = arith.maximumf %41, %42 : vector<24x256xf32>
    %44 = vector.broadcast %16 : vector<1x256xf32> to vector<24x256xf32>
    %45 = arith.mulf %43, %44 : vector<24x256xf32>
    %c0_28 = arith.constant 0 : index
    %c128_29 = arith.constant 128 : index
    %46 = vector.load %arg6[%c0_28, %c128_29] : memref<24x512xf32, #tpu.memory_space<vmem>>, vector<24x256xf32>
    tpu.vector_store %arg6[%c0_28, %c128_29], %45 {strides = array<i32>} : memref<24x512xf32, #tpu.memory_space<vmem>>, vector<24x256xf32>,
    %c0_30 = arith.constant 0 : index
    %c0_31 = arith.constant 0 : index
    %47 = vector.load %arg6[%c0_30, %c0_31] : memref<24x512xf32, #tpu.memory_space<vmem>>, vector<24x512xf32>
    %48 = vector.extract_strided_slice %47 {offsets = [0, 124], sizes = [24, 256], strides = [1, 1]} : vector<24x512xf32> to vector<24x256xf32>
    %c0_32 = arith.constant 0 : index
    %c0_33 = arith.constant 0 : index
    %49 = vector.load %arg7[%c0_32, %c0_33] : memref<216x256xf32, #tpu.memory_space<vmem>>, vector<24x256xf32>
    tpu.vector_store %arg7[%c0_32, %c0_33], %48 {strides = array<i32>} : memref<216x256xf32, #tpu.memory_space<vmem>>, vector<24x256xf32>,
    %50 = vector.extract_strided_slice %47 {offsets = [0, 125], sizes = [24, 256], strides = [1, 1]} : vector<24x512xf32> to vector<24x256xf32>
    %c24_34 = arith.constant 24 : index
    %c0_35 = arith.constant 0 : index
    %51 = vector.load %arg7[%c24_34, %c0_35] : memref<216x256xf32, #tpu.memory_space<vmem>>, vector<24x256xf32>
    tpu.vector_store %arg7[%c24_34, %c0_35], %50 {strides = array<i32>} : memref<216x256xf32, #tpu.memory_space<vmem>>, vector<24x256xf32>,
    %52 = vector.extract_strided_slice %47 {offsets = [0, 126], sizes = [24, 256], strides = [1, 1]} : vector<24x512xf32> to vector<24x256xf32>
    %c48_36 = arith.constant 48 : index
    %c0_37 = arith.constant 0 : index
    %53 = vector.load %arg7[%c48_36, %c0_37] : memref<216x256xf32, #tpu.memory_space<vmem>>, vector<24x256xf32>
    tpu.vector_store %arg7[%c48_36, %c0_37], %52 {strides = array<i32>} : memref<216x256xf32, #tpu.memory_space<vmem>>, vector<24x256xf32>,
    %54 = vector.extract_strided_slice %47 {offsets = [0, 127], sizes = [24, 256], strides = [1, 1]} : vector<24x512xf32> to vector<24x256xf32>
    %c72_38 = arith.constant 72 : index
    %c0_39 = arith.constant 0 : index
    %55 = vector.load %arg7[%c72_38, %c0_39] : memref<216x256xf32, #tpu.memory_space<vmem>>, vector<24x256xf32>
    tpu.vector_store %arg7[%c72_38, %c0_39], %54 {strides = array<i32>} : memref<216x256xf32, #tpu.memory_space<vmem>>, vector<24x256xf32>,
    %56 = vector.extract_strided_slice %47 {offsets = [0, 128], sizes = [24, 256], strides = [1, 1]} : vector<24x512xf32> to vector<24x256xf32>
    %c96_40 = arith.constant 96 : index
    %c0_41 = arith.constant 0 : index
    %57 = vector.load %arg7[%c96_40, %c0_41] : memref<216x256xf32, #tpu.memory_space<vmem>>, vector<24x256xf32>
    tpu.vector_store %arg7[%c96_40, %c0_41], %56 {strides = array<i32>} : memref<216x256xf32, #tpu.memory_space<vmem>>, vector<24x256xf32>,
    %58 = vector.extract_strided_slice %47 {offsets = [0, 129], sizes = [24, 256], strides = [1, 1]} : vector<24x512xf32> to vector<24x256xf32>
    %c120_42 = arith.constant 120 : index
    %c0_43 = arith.constant 0 : index
    %59 = vector.load %arg7[%c120_42, %c0_43] : memref<216x256xf32, #tpu.memory_space<vmem>>, vector<24x256xf32>
    tpu.vector_store %arg7[%c120_42, %c0_43], %58 {strides = array<i32>} : memref<216x256xf32, #tpu.memory_space<vmem>>, vector<24x256xf32>,
    %60 = vector.extract_strided_slice %47 {offsets = [0, 130], sizes = [24, 256], strides = [1, 1]} : vector<24x512xf32> to vector<24x256xf32>
    %c144_44 = arith.constant 144 : index
    %c0_45 = arith.constant 0 : index
    %61 = vector.load %arg7[%c144_44, %c0_45] : memref<216x256xf32, #tpu.memory_space<vmem>>, vector<24x256xf32>
    tpu.vector_store %arg7[%c144_44, %c0_45], %60 {strides = array<i32>} : memref<216x256xf32, #tpu.memory_space<vmem>>, vector<24x256xf32>,
    %62 = vector.extract_strided_slice %47 {offsets = [0, 131], sizes = [24, 256], strides = [1, 1]} : vector<24x512xf32> to vector<24x256xf32>
    %c168_46 = arith.constant 168 : index
    %c0_47 = arith.constant 0 : index
    %63 = vector.load %arg7[%c168_46, %c0_47] : memref<216x256xf32, #tpu.memory_space<vmem>>, vector<24x256xf32>
    tpu.vector_store %arg7[%c168_46, %c0_47], %62 {strides = array<i32>} : memref<216x256xf32, #tpu.memory_space<vmem>>, vector<24x256xf32>,
    %64 = vector.extract_strided_slice %47 {offsets = [0, 132], sizes = [24, 256], strides = [1, 1]} : vector<24x512xf32> to vector<24x256xf32>
    %c192_48 = arith.constant 192 : index
    %c0_49 = arith.constant 0 : index
    %65 = vector.load %arg7[%c192_48, %c0_49] : memref<216x256xf32, #tpu.memory_space<vmem>>, vector<24x256xf32>
    tpu.vector_store %arg7[%c192_48, %c0_49], %64 {strides = array<i32>} : memref<216x256xf32, #tpu.memory_space<vmem>>, vector<24x256xf32>,
    %c24_50 = arith.constant 24 : index
    %c0_51 = arith.constant 0 : index
    %66 = vector.load %arg2[%c24_50, %c0_51] : memref<72x216xf32, #tpu.memory_space<vmem>>, vector<24x216xf32>
    %c24_52 = arith.constant 24 : index
    %c0_53 = arith.constant 0 : index
    %67 = vector.load %arg3[%c24_52, %c0_53] : memref<80x256xf32, #tpu.memory_space<vmem>>, vector<24x1xf32>
    %c0_54 = arith.constant 0 : index
    %c0_55 = arith.constant 0 : index
    %68 = vector.load %arg7[%c0_54, %c0_55] : memref<216x256xf32, #tpu.memory_space<vmem>>, vector<216x256xf32>
    %cst_56 = arith.constant dense<0.000000e+00> : vector<24x256xf32>
    %69 = tpu.matmul %66, %68, %cst_56 {dimension_numbers = #tpu.dot_dimension_numbers<[1], [0], [0], [1], [0, 0, 1, 1], [], []>} : vector<24x216xf32>, vector<216x256xf32>, vector<24x256xf32> -> vector<24x256xf32>
    %70 = vector.broadcast %67 : vector<24x1xf32> to vector<24x256xf32>
    %71 = arith.addf %69, %70 : vector<24x256xf32>
    %cst_57 = arith.constant 0.000000e+00 : f32
    %72 = vector.broadcast %cst_57 : f32 to vector<24x256xf32>
    %73 = arith.maximumf %71, %72 : vector<24x256xf32>
    %74 = vector.broadcast %16 : vector<1x256xf32> to vector<24x256xf32>
    %75 = arith.mulf %73, %74 : vector<24x256xf32>
    %c0_58 = arith.constant 0 : index
    %c128_59 = arith.constant 128 : index
    %76 = vector.load %arg6[%c0_58, %c128_59] : memref<24x512xf32, #tpu.memory_space<vmem>>, vector<24x256xf32>
    tpu.vector_store %arg6[%c0_58, %c128_59], %75 {strides = array<i32>} : memref<24x512xf32, #tpu.memory_space<vmem>>, vector<24x256xf32>,
    %c0_60 = arith.constant 0 : index
    %c0_61 = arith.constant 0 : index
    %77 = vector.load %arg6[%c0_60, %c0_61] : memref<24x512xf32, #tpu.memory_space<vmem>>, vector<24x512xf32>
    %78 = vector.extract_strided_slice %77 {offsets = [0, 124], sizes = [24, 256], strides = [1, 1]} : vector<24x512xf32> to vector<24x256xf32>
    %c0_62 = arith.constant 0 : index
    %c0_63 = arith.constant 0 : index
    %79 = vector.load %arg7[%c0_62, %c0_63] : memref<216x256xf32, #tpu.memory_space<vmem>>, vector<24x256xf32>
    tpu.vector_store %arg7[%c0_62, %c0_63], %78 {strides = array<i32>} : memref<216x256xf32, #tpu.memory_space<vmem>>, vector<24x256xf32>,
    %80 = vector.extract_strided_slice %77 {offsets = [0, 125], sizes = [24, 256], strides = [1, 1]} : vector<24x512xf32> to vector<24x256xf32>
    %c24_64 = arith.constant 24 : index
    %c0_65 = arith.constant 0 : index
    %81 = vector.load %arg7[%c24_64, %c0_65] : memref<216x256xf32, #tpu.memory_space<vmem>>, vector<24x256xf32>
    tpu.vector_store %arg7[%c24_64, %c0_65], %80 {strides = array<i32>} : memref<216x256xf32, #tpu.memory_space<vmem>>, vector<24x256xf32>,
    %82 = vector.extract_strided_slice %77 {offsets = [0, 126], sizes = [24, 256], strides = [1, 1]} : vector<24x512xf32> to vector<24x256xf32>
    %c48_66 = arith.constant 48 : index
    %c0_67 = arith.constant 0 : index
    %83 = vector.load %arg7[%c48_66, %c0_67] : memref<216x256xf32, #tpu.memory_space<vmem>>, vector<24x256xf32>
    tpu.vector_store %arg7[%c48_66, %c0_67], %82 {strides = array<i32>} : memref<216x256xf32, #tpu.memory_space<vmem>>, vector<24x256xf32>,
    %84 = vector.extract_strided_slice %77 {offsets = [0, 127], sizes = [24, 256], strides = [1, 1]} : vector<24x512xf32> to vector<24x256xf32>
    %c72_68 = arith.constant 72 : index
    %c0_69 = arith.constant 0 : index
    %85 = vector.load %arg7[%c72_68, %c0_69] : memref<216x256xf32, #tpu.memory_space<vmem>>, vector<24x256xf32>
    tpu.vector_store %arg7[%c72_68, %c0_69], %84 {strides = array<i32>} : memref<216x256xf32, #tpu.memory_space<vmem>>, vector<24x256xf32>,
    %86 = vector.extract_strided_slice %77 {offsets = [0, 128], sizes = [24, 256], strides = [1, 1]} : vector<24x512xf32> to vector<24x256xf32>
    %c96_70 = arith.constant 96 : index
    %c0_71 = arith.constant 0 : index
    %87 = vector.load %arg7[%c96_70, %c0_71] : memref<216x256xf32, #tpu.memory_space<vmem>>, vector<24x256xf32>
    tpu.vector_store %arg7[%c96_70, %c0_71], %86 {strides = array<i32>} : memref<216x256xf32, #tpu.memory_space<vmem>>, vector<24x256xf32>,
    %88 = vector.extract_strided_slice %77 {offsets = [0, 129], sizes = [24, 256], strides = [1, 1]} : vector<24x512xf32> to vector<24x256xf32>
    %c120_72 = arith.constant 120 : index
    %c0_73 = arith.constant 0 : index
    %89 = vector.load %arg7[%c120_72, %c0_73] : memref<216x256xf32, #tpu.memory_space<vmem>>, vector<24x256xf32>
    tpu.vector_store %arg7[%c120_72, %c0_73], %88 {strides = array<i32>} : memref<216x256xf32, #tpu.memory_space<vmem>>, vector<24x256xf32>,
    %90 = vector.extract_strided_slice %77 {offsets = [0, 130], sizes = [24, 256], strides = [1, 1]} : vector<24x512xf32> to vector<24x256xf32>
    %c144_74 = arith.constant 144 : index
    %c0_75 = arith.constant 0 : index
    %91 = vector.load %arg7[%c144_74, %c0_75] : memref<216x256xf32, #tpu.memory_space<vmem>>, vector<24x256xf32>
    tpu.vector_store %arg7[%c144_74, %c0_75], %90 {strides = array<i32>} : memref<216x256xf32, #tpu.memory_space<vmem>>, vector<24x256xf32>,
    %92 = vector.extract_strided_slice %77 {offsets = [0, 131], sizes = [24, 256], strides = [1, 1]} : vector<24x512xf32> to vector<24x256xf32>
    %c168_76 = arith.constant 168 : index
    %c0_77 = arith.constant 0 : index
    %93 = vector.load %arg7[%c168_76, %c0_77] : memref<216x256xf32, #tpu.memory_space<vmem>>, vector<24x256xf32>
    tpu.vector_store %arg7[%c168_76, %c0_77], %92 {strides = array<i32>} : memref<216x256xf32, #tpu.memory_space<vmem>>, vector<24x256xf32>,
    %94 = vector.extract_strided_slice %77 {offsets = [0, 132], sizes = [24, 256], strides = [1, 1]} : vector<24x512xf32> to vector<24x256xf32>
    %c192_78 = arith.constant 192 : index
    %c0_79 = arith.constant 0 : index
    %95 = vector.load %arg7[%c192_78, %c0_79] : memref<216x256xf32, #tpu.memory_space<vmem>>, vector<24x256xf32>
    tpu.vector_store %arg7[%c192_78, %c0_79], %94 {strides = array<i32>} : memref<216x256xf32, #tpu.memory_space<vmem>>, vector<24x256xf32>,
    %c48_80 = arith.constant 48 : index
    %c0_81 = arith.constant 0 : index
    %96 = vector.load %arg2[%c48_80, %c0_81] : memref<72x216xf32, #tpu.memory_space<vmem>>, vector<24x216xf32>
    %c48_82 = arith.constant 48 : index
    %c0_83 = arith.constant 0 : index
    %97 = vector.load %arg3[%c48_82, %c0_83] : memref<80x256xf32, #tpu.memory_space<vmem>>, vector<24x1xf32>
    %c0_84 = arith.constant 0 : index
    %c0_85 = arith.constant 0 : index
    %98 = vector.load %arg7[%c0_84, %c0_85] : memref<216x256xf32, #tpu.memory_space<vmem>>, vector<216x256xf32>
    %cst_86 = arith.constant dense<0.000000e+00> : vector<24x256xf32>
    %99 = tpu.matmul %96, %98, %cst_86 {dimension_numbers = #tpu.dot_dimension_numbers<[1], [0], [0], [1], [0, 0, 1, 1], [], []>} : vector<24x216xf32>, vector<216x256xf32>, vector<24x256xf32> -> vector<24x256xf32>
    %100 = vector.broadcast %97 : vector<24x1xf32> to vector<24x256xf32>
    %101 = arith.addf %99, %100 : vector<24x256xf32>
    %cst_87 = arith.constant 0.000000e+00 : f32
    %102 = vector.broadcast %cst_87 : f32 to vector<24x256xf32>
    %103 = arith.maximumf %101, %102 : vector<24x256xf32>
    %c0_88 = arith.constant 0 : index
    %c0_89 = arith.constant 0 : index
    %104 = vector.load %arg4[%c0_88, %c0_89] : memref<256x260xf32, #tpu.memory_space<vmem>>, vector<256x260xf32>
    %c72_90 = arith.constant 72 : index
    %c0_91 = arith.constant 0 : index
    %105 = vector.load %arg3[%c72_90, %c0_91] : memref<80x256xf32, #tpu.memory_space<vmem>>, vector<1x256xf32>
    %c73 = arith.constant 73 : index
    %c0_92 = arith.constant 0 : index
    %106 = vector.load %arg3[%c73, %c0_92] : memref<80x256xf32, #tpu.memory_space<vmem>>, vector<1x4xf32>
    %107 = vector.extract_strided_slice %103 {offsets = [0, 0], sizes = [1, 256], strides = [1, 1]} : vector<24x256xf32> to vector<1x256xf32>
    %108 = vector.extract_strided_slice %104 {offsets = [0, 0], sizes = [256, 256], strides = [1, 1]} : vector<256x260xf32> to vector<256x256xf32>
    %cst_93 = arith.constant dense<0.000000e+00> : vector<1x256xf32>
    %109 = tpu.matmul %107, %108, %cst_93 {dimension_numbers = #tpu.dot_dimension_numbers<[1], [0], [0], [1], [0, 0, 1, 1], [], []>} : vector<1x256xf32>, vector<256x256xf32>, vector<1x256xf32> -> vector<1x256xf32>
    %110 = arith.addf %109, %105 : vector<1x256xf32>
    %cst_94 = arith.constant 0.000000e+00 : f32
    %111 = vector.broadcast %cst_94 : f32 to vector<1x256xf32>
    %112 = arith.maximumf %110, %111 : vector<1x256xf32>
    %113 = vector.extract_strided_slice %104 {offsets = [0, 256], sizes = [256, 4], strides = [1, 1]} : vector<256x260xf32> to vector<256x4xf32>
    %cst_95 = arith.constant dense<0.000000e+00> : vector<1x4xf32>
    %114 = tpu.matmul %112, %113, %cst_95 {dimension_numbers = #tpu.dot_dimension_numbers<[1], [0], [0], [1], [0, 0, 1, 1], [], []>} : vector<1x256xf32>, vector<256x4xf32>, vector<1x4xf32> -> vector<1x4xf32>
    %115 = arith.addf %114, %106 : vector<1x4xf32>
    %cst_96 = arith.constant 0.000000e+00 : f32
    %116 = vector.broadcast %cst_96 : f32 to vector<1x4xf32>
    %117 = arith.maximumf %115, %116 : vector<1x4xf32>
    %c0_97 = arith.constant 0 : index
    %c0_98 = arith.constant 0 : index
    %c0_99 = arith.constant 0 : index
    %118 = vector.load %arg5[%c0_97, %c0_98, %c0_99] : memref<1x1x4xf32, #tpu.memory_space<vmem>>, vector<1x1x4xf32>
    %119 = vector.shape_cast %118 : vector<1x1x4xf32> to vector<1x4xf32>
    %120 = vector.shape_cast %117 : vector<1x4xf32> to vector<1x1x4xf32>
    tpu.vector_store %arg5[%c0_97, %c0_98, %c0_99], %120 {strides = array<i32>} : memref<1x1x4xf32, #tpu.memory_space<vmem>>, vector<1x1x4xf32>,
    return
  }
  func.func @transform_0(%arg0: i32) -> (i32, i32) {
    %c0_i32 = arith.constant 0 : i32
    %c0_i32_0 = arith.constant 0 : i32
    return %c0_i32, %arg0 : i32, i32
  }
  func.func @transform_1(%arg0: i32) -> (i32, i32) {
    %c0_i32 = arith.constant 0 : i32
    %c0_i32_0 = arith.constant 0 : i32
    %c0_i32_1 = arith.constant 0 : i32
    return %c0_i32, %c0_i32_0 : i32, i32
  }
  func.func @transform_2(%arg0: i32) -> (i32, i32) {
    %c0_i32 = arith.constant 0 : i32
    %c0_i32_0 = arith.constant 0 : i32
    %c0_i32_1 = arith.constant 0 : i32
    return %c0_i32, %c0_i32_0 : i32, i32
  }
  func.func @transform_3(%arg0: i32) -> (i32, i32) {
    %c0_i32 = arith.constant 0 : i32
    %c0_i32_0 = arith.constant 0 : i32
    %c0_i32_1 = arith.constant 0 : i32
    return %c0_i32, %c0_i32_0 : i32, i32
  }
  func.func @transform_4(%arg0: i32) -> (i32, i32, i32) {
    %c0_i32 = arith.constant 0 : i32
    %c0_i32_0 = arith.constant 0 : i32
    %c0_i32_1 = arith.constant 0 : i32
    return %arg0, %c0_i32, %c0_i32_0 : i32, i32, i32
  }
}

</mosaic_0001>

<bundles_post_ra>
// kernel: tpu_custom_call.1
= control target key start
LH: loop header
LB: loop body
LE: loop exit
PB: predicated region body
PF: predicated region fallthrough
CT: control target
= control target key end

     0   :  { %9 = vsyncpa [#allocation6], 0  ;;  %s3725_s0 = inlined_call_operand.vmem [shape: f32[24,512], index: 0, kind: input, shape index: {}]   ;;  %s3726_s1 = inlined_call_operand.vmem [shape: f32[72,216], index: 1, kind: input, shape index: {}]   ;;  %s3727_s2 = inlined_call_operand.vmem [shape: f32[80,256], index: 2, kind: input, shape index: {}]   ;;  %s3728_s3 = inlined_call_operand.vmem [shape: f32[256,260], index: 3, kind: input, shape index: {}]   ;;  %s3729_s4 = inlined_call_operand.hbm [shape: f32[2,1,4], index: 4, kind: output, shape index: {}]  }
   0x1   :  { %11 = vsyncpa [#allocation6 + $0x1], 0  ;;  %s2418_s15 = smov 0   ;;  %s2420_s16 = smov 0  }
   0x2   :  { %s2422_s17 = smov 0   ;;  %s2424_s18 = smov 0  }
   0x3 LB: > { %s2091_s19 = sadd.s32 4294967295, %s2380_s18   ;;  %s2092_s20 = sadd.s32 4294967294, %s2380_s18   ;;  %s2380_s18 = sphi %s2424_s18, %s3737_s18   ;;  %s2376_s17 = sphi %s2422_s17, %s3736_s17   ;;  %s2372_s16 = sphi %s2420_s16, %s3735_s16   ;;  %s2368_s15 = sphi %s2418_s15, %s3734_s15  }
   0x4   : > { %s2441_s21 = sadd.s32 1, %s2380_s18   ;;  %s24_s22 = sadd.s32 1, %s2376_s17 }
   0x5   : > { %s21_s23 = ssub.s32 %s2380_s18, %s2441_s21  ;;  %p31_p0 = scmp.ne.s32.totalorder %s2376_s17, %s2372_s16 }
   0x6   : > { %p22_p1 = scmp.eq.s32.totalorder %s21_s23, 0  ;;  %p32_p2 = scmp.eq.s32.totalorder %s2380_s18, 0 }
   0x7   : > { %p124_p3 = scmp.eq.s32.totalorder %s2091_s19, 1  ;;  %p129_p4 = scmp.ne.s32.totalorder %s2372_s16, %s2368_s15 }
   0x8   : > { %s2454_s24 = scalar_select %p22_p1, %s2376_s17, %s24_s22  }
   0x9   : > { %p33_p5 = por %p32_p2, %p31_p0  ;;  %p2456_p6 = por %p124_p3, %p31_p0 }
   0xa   : > { %p130_p7 = scmp.eq.s32.totalorder %s2092_s20, 1  ;;  %p3730_p9 = scmp.ge.s32.totalorder %s2380_s18, 2 }
   0xc   : > { %p2460_p8 = por %p130_p7, %p129_p4  ;;  %155 = sbr.rel (%p3730_p9) target bundleno = 24 (0x18), region = 28 }
  0x11   : > { %158 = sbr.rel (!%p33_p5) target bundleno = 24 (0x18), region = 32  ;;  %s160_s27 = sand.u32 (%p33_p5), 1, %s2376_s17  }
  0x12   : > { %s2111_s28 = sshll.u32 (%p33_p5), %s2380_s18, 4  ;;  %s2147_s29 = smul.u32 (%p33_p5), 48, %s160_s27 }
  0x13   : > { %s165_s6 = scalar_lea.vmem (%p33_p5), %s3725_s0, %s2111_s28 }
  0x14   : > { %v178_v0 = vld [vmem:[%s165_s6] sm:$0xff] (%p33_p5)  ;;  %v180_v1 = vld [vmem:[%s165_s6 + $0x8] sm:$0xff] (%p33_p5)  ;;  %s162_s7 = scalar_lea.vmem (%p33_p5), [#allocation4], %s2147_s29 }
  0x15   : > { %v182_v2 = vld [vmem:[%s165_s6 + $0x20] sm:$0xff] (%p33_p5)  ;;  %v184_v3 = vld [vmem:[%s165_s6 + $0x28] sm:$0xff] (%p33_p5)  ;;  %179 = vst [vmem:[%s162_s7] sm:$0xff] (%p33_p5), %v178_v0  ;;  %181 = vst [vmem:[%s162_s7 + $0x8] sm:$0xff] (%p33_p5), %v180_v1 }
  0x16   : > { %v186_v4 = vld [vmem:[%s165_s6 + $0x40] sm:$0xff]  ;;  %v188_v5 = vld [vmem:[%s165_s6 + $0x48] sm:$0xff]  ;;  %183 = vst [vmem:[%s162_s7 + $0x10] sm:$0xff] %v182_v2  ;;  %185 = vst [vmem:[%s162_s7 + $0x18] sm:$0xff] %v184_v3 }
  0x17   : > { %187 = vst [vmem:[%s162_s7 + $0x20] sm:$0xff] %v186_v4  ;;  %189 = vst [vmem:[%s162_s7 + $0x28] sm:$0xff] %v188_v5 }
  0x18 PF: > { %p2097_p10 = scmp.ge.s32.totalorder %s2380_s18, 1  ;;  %p194_p11 = scmp.lt.s32.totalorder %s2380_s18, 3 }
  0x1a   : > { %p195_p12 = pnand %p2097_p10, %p194_p11 }
  0x1b   : > { %s2475_s8 = sand.u32 (!%p195_p12), 1, %s2372_s16   ;;  %s2383_s9 = smov (!%p195_p12), 127  }
  0x1c   : > { %198 = sbr.rel (%p195_p12) target bundleno = 1726 (0x6be), region = 55  ;;  %s2384_s12 = smov (!%p195_p12), 1  }
  0x1d   : > { %s2148_s10 = smul.u32 (!%p195_p12), 48, %s2475_s8  ;;  %s2385_s13 = smov (!%p195_p12), 2  }
  0x1e   : > { %s2386_s14 = smov (!%p195_p12), 3   ;;  %s2387_s20 = smov (!%p195_p12), 4  }
  0x1f   : > { %s203_s11 = scalar_lea.vmem (!%p195_p12), [#allocation4], %s2148_s10  ;;  %s2388_s22 = smov (!%p195_p12), 124  }
  0x20   : > { %s2389_s23 = smov (!%p195_p12), 125   ;;  %s2390_s27 = smov (!%p195_p12), 126  }
  0x21   : > { %v2382_v6 = vmov 0.0   ;;  %v2480_v7 = vld [vmem:[%s203_s11 + $0x8] sm:$0xff]  ;;  %v2482_v8 = vld [vmem:[%s203_s11] sm:$0xff]  ;;  %v2496_v11 = vld [vmem:[%s203_s11 + $0x10] sm:$0xff]  ;;  %vm453_vm0 = vcmask 1039360   ;;  %vm661_vm1 = vcmask 719872  }
  0x22   : > { %439 = vrot.lane.b32.xlu0 %v2382_v6, %s2383_s9  ;;  %435 = vrot.lane.b32.xlu1 %v2482_v8, %s2383_s9  ;;  %v2488_v9 = vld [vmem:[%s203_s11 + $0x28] sm:$0xff]  ;;  %v2490_v10 = vld [vmem:[%s203_s11 + $0x20] sm:$0xff]  ;;  %vm407_vm2 = vcmask 7168   ;;  %v2391_v26 = vmov 0   ;;  %vm370_vm3 = vcmask 15360   ;;  %vm333_vm4 = vcmask 23552  }
  0x23   : > { %v2502_v12 = vld [vmem:[%s203_s11 + $0x18] sm:$0xff]  ;;  %v589_v23 = vld [vmem:[%s3727_s2] sm:$0xff]  ;;  %2238 = vset.pattern.permute.xlu0 %v2391_v26  ;;  %2239 = vset.pattern.permute.xlu1 %v2391_v26  ;;  %v590_v36 = vld [vmem:[%s3727_s2 + $0x10] sm:$0xff]  ;;  %vm296_vm5 = vcmask 31744   ;;  %vm564_vm6 = vcmask 1014784   ;;  %vm527_vm7 = vcmask 1022976  }
  0x24   : > { %v584_v14 = vld [vmem:[%s3726_s1 + $0x8] sm:$0xff]  ;;  %v591_v31 = vld [vmem:[%s3727_s2 + $0x20] sm:$0xff]  ;;  %vm490_vm8 = vcmask 1031168   ;;  %vm2016_vm15 = vcmask 24576   ;;  %s2019_s7 = scalar_lea.sflag [#allocation6], %s2475_s8  ;;  %s2392_s11 = smov [#allocation5]  }
  0x25   : > { %2098 = vmatprep.mubr.msk.f32.mxu0 %vm661_vm1, %v584_v14  ;;  %s2324_s28 = sshll.u32 %s2392_s11, 4  ;;  %s2325_s28 = int_to_ptr.vmem [resolvable:$false] %s2324_s28 }
  0x26   : > { %437 = vrot.lane.b32.xlu0 %v2480_v7, %s2383_s9  ;;  %403 = vrot.lane.b32.xlu1 %v2490_v10, %s2384_s12 }
  0x2a   : > { %405 = vrot.lane.b32.xlu0 %v2488_v9, %s2384_s12  ;;  %2199 = vrot.lane.b32.xlu1 %v2382_v6, %s2384_s12 }
  0x2e   : > { %397 = vrot.lane.b32.xlu0 %v2496_v11, %s2384_s12  ;;  %399 = vrot.lane.b32.xlu1 %v2502_v12, %s2384_s12 }
  0x32   : > { %391 = vrot.lane.b32.xlu0 %v2482_v8, %s2384_s12  ;;  %393 = vrot.lane.b32.xlu1 %v2480_v7, %s2384_s12 }
  0x36   : > { %389 = vrot.lane.b32.xlu0 %v2382_v6, %s2384_s12  ;;  %366 = vrot.lane.b32.xlu1 %v2490_v10, %s2385_s13 }
  0x3a   : > { %368 = vrot.lane.b32.xlu0 %v2488_v9, %s2385_s13  ;;  %2204 = vrot.lane.b32.xlu1 %v2382_v6, %s2385_s13 }
  0x3e   : > { %360 = vrot.lane.b32.xlu0 %v2496_v11, %s2385_s13  ;;  %362 = vrot.lane.b32.xlu1 %v2502_v12, %s2385_s13 }
  0x42   : > { %354 = vrot.lane.b32.xlu0 %v2482_v8, %s2385_s13  ;;  %356 = vrot.lane.b32.xlu1 %v2480_v7, %s2385_s13 }
  0x46   : > { %352 = vrot.lane.b32.xlu0 %v2382_v6, %s2385_s13  ;;  %329 = vrot.lane.b32.xlu1 %v2490_v10, %s2386_s14 }
  0x4a   : > { %331 = vrot.lane.b32.xlu0 %v2488_v9, %s2386_s14  ;;  %2209 = vrot.lane.b32.xlu1 %v2382_v6, %s2386_s14 }
  0x4e   : > { %323 = vrot.lane.b32.xlu0 %v2496_v11, %s2386_s14  ;;  %325 = vrot.lane.b32.xlu1 %v2502_v12, %s2386_s14 }
  0x52   : > { %317 = vrot.lane.b32.xlu0 %v2482_v8, %s2386_s14  ;;  %319 = vrot.lane.b32.xlu1 %v2480_v7, %s2386_s14 }
  0x56   : > { %315 = vrot.lane.b32.xlu0 %v2382_v6, %s2386_s14  ;;  %292 = vrot.lane.b32.xlu1 %v2490_v10, %s2387_s20 }
  0x5a   : > { %294 = vrot.lane.b32.xlu0 %v2488_v9, %s2387_s20  ;;  %2214 = vrot.lane.b32.xlu1 %v2382_v6, %s2387_s20 }
  0x5e   : > { %286 = vrot.lane.b32.xlu0 %v2496_v11, %s2387_s20  ;;  %288 = vrot.lane.b32.xlu1 %v2502_v12, %s2387_s20 }
  0x62   : > { %280 = vrot.lane.b32.xlu0 %v2482_v8, %s2387_s20  ;;  %282 = vrot.lane.b32.xlu1 %v2480_v7, %s2387_s20 }
  0x66   : > { %278 = vrot.lane.b32.xlu0 %v2382_v6, %s2387_s20  ;;  %560 = vrot.lane.b32.xlu1 %v2488_v9, %s2388_s22 }
  0x6a   : > { %2219 = vrot.lane.b32.xlu0 %v2382_v6, %s2388_s22  ;;  %558 = vrot.lane.b32.xlu1 %v2490_v10, %s2388_s22 }
  0x6e   : > { %554 = vrot.lane.b32.xlu0 %v2502_v12, %s2388_s22  ;;  %552 = vrot.lane.b32.xlu1 %v2496_v11, %s2388_s22 }
  0x72   : > { %548 = vrot.lane.b32.xlu0 %v2480_v7, %s2388_s22  ;;  %550 = vrot.lane.b32.xlu1 %v2382_v6, %s2388_s22 }
  0x76   : > { %546 = vrot.lane.b32.xlu0 %v2482_v8, %s2388_s22  ;;  %523 = vrot.lane.b32.xlu1 %v2488_v9, %s2389_s23 }
  0x7a   : > { %2224 = vrot.lane.b32.xlu0 %v2382_v6, %s2389_s23  ;;  %521 = vrot.lane.b32.xlu1 %v2490_v10, %s2389_s23 }
  0x7e   : > { %517 = vrot.lane.b32.xlu0 %v2502_v12, %s2389_s23  ;;  %515 = vrot.lane.b32.xlu1 %v2496_v11, %s2389_s23 }
  0x82   : > { %511 = vrot.lane.b32.xlu0 %v2480_v7, %s2389_s23  ;;  %513 = vrot.lane.b32.xlu1 %v2382_v6, %s2389_s23 }
  0x86   : > { %509 = vrot.lane.b32.xlu0 %v2482_v8, %s2389_s23  ;;  %486 = vrot.lane.b32.xlu1 %v2488_v9, %s2390_s27 }
  0x8a   : > { %2229 = vrot.lane.b32.xlu0 %v2382_v6, %s2390_s27  ;;  %484 = vrot.lane.b32.xlu1 %v2490_v10, %s2390_s27 }
  0x8e   : > { %480 = vrot.lane.b32.xlu0 %v2502_v12, %s2390_s27  ;;  %478 = vrot.lane.b32.xlu1 %v2496_v11, %s2390_s27 }
  0x92   : > { %474 = vrot.lane.b32.xlu0 %v2480_v7, %s2390_s27  ;;  %476 = vrot.lane.b32.xlu1 %v2382_v6, %s2390_s27 }
  0x94   : > { %v440_v13 = vpop.permute.xlu0 %439  ;;  %v436_v16 = vpop.permute.xlu1 %435 }
  0x96   : > { %472 = vrot.lane.b32.xlu0 %v2482_v8, %s2390_s27  ;;  %449 = vrot.lane.b32.xlu1 %v2488_v9, %s2383_s9 }
  0x98   : > { %v438_v15 = vpop.permute.xlu0 %437  ;;  %v404_v20 = vpop.permute.xlu1 %403 }
  0x99   : > { %v455_v17 = vsel %vm453_vm0, %v438_v15, %v440_v13  ;;  %v454_v18 = vsel %vm453_vm0, %v436_v16, %v438_v15 }
  0x9a   : > { %671 = vmatprep.subr.mxu0 %v455_v17  ;;  %2234 = vrot.lane.b32.xlu0 %v2382_v6, %s2383_s9 }
  0x9b   : > { %672 = vmatpush1.msra.mxu0 %v454_v18  ;;  %447 = vrot.lane.b32.xlu1 %v2490_v10, %s2383_s9 }
  0x9c   : > { %v406_v19 = vpop.permute.xlu0 %405  ;;  %673 = vmatprep.subr.mxu0 %v2488_v9  ;;  %v2200_v22 = vpop.permute.xlu1 %2199 }
  0x9d   : > { %674 = vmatpush1.msra.mxu0 %v2490_v10  ;;  %v2201_v24 = vunpack.i.l.bf16 %v2200_v22  ;;  %v413_v25 = vsel %vm407_vm2, %v404_v20, %v406_v19  ;;  %v2202_v27 = vunpack.i.h.bf16 %v2200_v22 }
  0x9e   : > { %675 = vmatprep.subr.mxu0 %v2502_v12  ;;  %443 = vrot.lane.b32.xlu0 %v2502_v12, %s2383_s9 }
  0x9f   : > { %676 = vmatpush1.msra.mxu0 %v2496_v11  ;;  %441 = vrot.lane.b32.xlu1 %v2496_v11, %s2383_s9  ;;  %v412_v28 = vsel %vm407_vm2, %v2201_v24, %v404_v20 }
  0xa0   : > { %v398_v21 = vpop.permute.xlu0 %397  ;;  %677 = vmatprep.subr.mxu0 %v2480_v7  ;;  %v400_v30 = vpop.permute.xlu1 %399 }
  0xa1   : > { %678 = vmatpush1.msra.mxu0 %v2482_v8  ;;  %v411_v32 = vsel %vm407_vm2, %v398_v21, %v400_v30  ;;  %v410_v33 = vsel %vm407_vm2, %v2202_v27, %v398_v21 }
  0xa2   : > { %679 = vmatprep.subr.mxu0 %v413_v25  ;;  %648 = vperm.xlu0 %2238, %v589_v23  }
  0xa3   : > { %680 = vmatpush1.msra.mxu0 %v412_v28  ;;  %658 = vperm.xlu1 %2239, %v591_v31  }
  0xa4   : > { %v392_v29 = vpop.permute.xlu0 %391  ;;  %681 = vmatprep.subr.mxu0 %v411_v32  ;;  %v394_v35 = vpop.permute.xlu1 %393 }
  0xa5   : > { %682 = vmatpush1.msra.mxu0 %v410_v33  ;;  %v409_v37 = vsel %vm407_vm2, %v392_v29, %v394_v35 }
  0xa6   : > { %901 = vrot.lane.b32.xlu0 %v2382_v6, %s2384_s12  ;;  %683 = vmatprep.subr.mxu0 %v409_v37 }
  0xa7   : > { %653 = vperm.xlu1 %2239, %v590_v36  }
  0xa8   : > { %v390_v34 = vpop.permute.xlu0 %389  ;;  %v367_v40 = vpop.permute.xlu1 %366 }
  0xa9   : > { %v408_v38 = vsel %vm407_vm2, %v390_v34, %v392_v29 }
  0xaa   : > { %865 = vrot.lane.b32.xlu0 %v2382_v6, %s2385_s13  ;;  %684 = vmatpush1.msra.mxu0 %v408_v38 }
  0xab   : > { %950 = vrot.lane.b32.xlu1 %v2382_v6, %s2383_s9 }
  0xac   : > { %v369_v39 = vpop.permute.xlu0 %368  ;;  %v2205_v43 = vpop.permute.xlu1 %2204 }
  0xad   : > { %v376_v41 = vsel %vm370_vm3, %v367_v40, %v369_v39  ;;  %v2206_v44 = vunpack.i.l.bf16 %v2205_v43  ;;  %v2207_v45 = vunpack.i.h.bf16 %v2205_v43 }
  0xae   : > { %685 = vmatprep.subr.mxu0 %v376_v41  ;;  %829 = vrot.lane.b32.xlu0 %v2382_v6, %s2386_s14 }
  0xaf   : > { %v375_v46 = vsel %vm370_vm3, %v2206_v44, %v367_v40  ;;  %2241 = vrot.lane.b32.xlu1 %v2382_v6, %s2384_s12 }
  0xb0   : > { %v361_v42 = vpop.permute.xlu0 %360  ;;  %v363_v48 = vpop.permute.xlu1 %362  ;;  %686 = vmatpush1.msra.mxu0 %v375_v46 }
  0xb1   : > { %v374_v49 = vsel %vm370_vm3, %v361_v42, %v363_v48  ;;  %v373_v50 = vsel %vm370_vm3, %v2207_v45, %v361_v42 }
  0xb2   : > { %793 = vrot.lane.b32.xlu0 %v2382_v6, %s2387_s20  ;;  %687 = vmatprep.subr.mxu0 %v374_v49 }
  0xb3   : > { %688 = vmatpush1.msra.mxu0 %v373_v50  ;;  %2246 = vrot.lane.b32.xlu1 %v2382_v6, %s2385_s13 }
  0xb4   : > { %v355_v47 = vpop.permute.xlu0 %354  ;;  %v357_v52 = vpop.permute.xlu1 %356 }
  0xb5   : > { %v372_v53 = vsel %vm370_vm3, %v355_v47, %v357_v52 }
  0xb6   : > { %2261 = vrot.lane.b32.xlu0 %v2382_v6, %s2388_s22  ;;  %689 = vmatprep.subr.mxu0 %v372_v53 }
  0xb7   : > { %2251 = vrot.lane.b32.xlu1 %v2382_v6, %s2386_s14 }
  0xb8   : > { %v353_v51 = vpop.permute.xlu0 %352  ;;  %v330_v56 = vpop.permute.xlu1 %329 }
  0xb9   : > { %v371_v54 = vsel %vm370_vm3, %v353_v51, %v355_v47 }
  0xba   : > { %690 = vmatpush1.msra.mxu0 %v371_v54  ;;  %2266 = vrot.lane.b32.xlu0 %v2382_v6, %s2389_s23 }
  0xbb   : > { %2256 = vrot.lane.b32.xlu1 %v2382_v6, %s2387_s20 }
  0xbc   : > { %v332_v55 = vpop.permute.xlu0 %331  ;;  %v2210_v59 = vpop.permute.xlu1 %2209 }
  0xbd   : > { %v339_v57 = vsel %vm333_vm4, %v330_v56, %v332_v55  ;;  %v2211_v60 = vunpack.i.l.bf16 %v2210_v59  ;;  %v2212_v61 = vunpack.i.h.bf16 %v2210_v59 }
  0xbe   : > { %691 = vmatprep.subr.mxu0 %v339_v57 }
  0xbf   : > { %v338_v62 = vsel %vm333_vm4, %v2211_v60, %v330_v56  ;;  %1058 = vrot.lane.b32.xlu1 %v2382_v6, %s2388_s22 }
  0xc0   : > { %v324_v58 = vpop.permute.xlu0 %323  ;;  %v326_v0 = vpop.permute.xlu1 %325  ;;  %692 = vmatpush1.msra.mxu0 %v338_v62 }
  0xc1   : > { %v337_v1 = vsel %vm333_vm4, %v324_v58, %v326_v0  ;;  %v336_v2 = vsel %vm333_vm4, %v2212_v61, %v324_v58 }
  0xc2   : > { %693 = vmatprep.subr.mxu0 %v337_v1 }
  0xc3   : > { %694 = vmatpush1.msra.mxu0 %v336_v2 }
  0xc4   : > { %v318_v63 = vpop.permute.xlu0 %317  ;;  %v320_v4 = vpop.permute.xlu1 %319 }
  0xc5   : > { %v335_v5 = vsel %vm333_vm4, %v318_v63, %v320_v4 }
  0xc6   : > { %695 = vmatprep.subr.mxu0 %v335_v5 }
  0xc8   : > { %v316_v3 = vpop.permute.xlu0 %315  ;;  %v293_v9 = vpop.permute.xlu1 %292 }
  0xc9   : > { %v334_v7 = vsel %vm333_vm4, %v316_v3, %v318_v63 }
  0xca   : > { %696 = vmatpush1.msra.mxu0 %v334_v7 }
  0xcc   : > { %v295_v8 = vpop.permute.xlu0 %294  ;;  %v2215_v12 = vpop.permute.xlu1 %2214 }
  0xcd   : > { %v302_v10 = vsel %vm296_vm5, %v293_v9, %v295_v8  ;;  %v2216_v13 = vunpack.i.l.bf16 %v2215_v12  ;;  %v2217_v14 = vunpack.i.h.bf16 %v2215_v12 }
  0xce   : > { %697 = vmatprep.subr.mxu0 %v302_v10 }
  0xcf   : > { %v301_v15 = vsel %vm296_vm5, %v2216_v13, %v293_v9 }
  0xd0   : > { %v287_v11 = vpop.permute.xlu0 %286  ;;  %v289_v17 = vpop.permute.xlu1 %288  ;;  %698 = vmatpush1.msra.mxu0 %v301_v15 }
  0xd1   : > { %v300_v18 = vsel %vm296_vm5, %v287_v11, %v289_v17  ;;  %v299_v19 = vsel %vm296_vm5, %v2217_v14, %v287_v11 }
  0xd2   : > { %699 = vmatprep.subr.mxu0 %v300_v18 }
  0xd3   : > { %700 = vmatpush1.msra.mxu0 %v299_v19  ;;  %v583_v19 = vld [vmem:[%s3726_s1] sm:$0xff] }
  0xd4   : > { %v281_v16 = vpop.permute.xlu0 %280  ;;  %v283_v21 = vpop.permute.xlu1 %282 }
  0xd5   : > { %v298_v22 = vsel %vm296_vm5, %v281_v16, %v283_v21  ;;  %v586_v21 = vld [vmem:[%s3726_s1 + $0x18] sm:$0xff] }
  0xd6   : > { %701 = vmatprep.subr.mxu0 %v298_v22  ;;  %v585_v22 = vld [vmem:[%s3726_s1 + $0x10] sm:$0xff] }
  0xd8   : > { %v279_v20 = vpop.permute.xlu0 %278  ;;  %v561_v25 = vpop.permute.xlu1 %560 }
  0xd9   : > { %v297_v23 = vsel %vm296_vm5, %v279_v20, %v281_v16 }
  0xda   : > { %702 = vmatpush1.msra.mxu0 %v297_v23  ;;  %v588_v23 = vld [vmem:[%s3726_s1 + $0x28] sm:$0xff] }
  0xdc   : > { %v2220_v24 = vpop.permute.xlu0 %2219  ;;  %v559_v30 = vpop.permute.xlu1 %558 }
  0xdd   : > { %v2222_v26 = vunpack.i.h.bf16 %v2220_v24  ;;  %v2221_v27 = vunpack.i.l.bf16 %v2220_v24  ;;  %v569_v31 = vsel %vm564_vm6, %v559_v30, %v561_v25  ;;  %v587_v24 = vld [vmem:[%s3726_s1 + $0x20] sm:$0xff] }
  0xdf   : > { %v570_v28 = vsel %vm564_vm6, %v561_v25, %v2221_v27  ;;  %v244_v25 = vlaneseq }
  0xe0   : > { %v555_v29 = vpop.permute.xlu0 %554  ;;  %713 = vmatprep.subr.mxu0 %v570_v28  ;;  %v553_v34 = vpop.permute.xlu1 %552 }
  0xe1   : > { %v568_v32 = vsel %vm564_vm6, %v555_v29, %v2222_v26  ;;  %714 = vmatpush2.msra.mxu0 %v569_v31  ;;  %v567_v35 = vsel %vm564_vm6, %v553_v34, %v555_v29  ;;  %v245_v26 = vand.u32 127, %v244_v25 }
  0xe2   : > { %715 = vmatprep.subr.mxu0 %v568_v32 }
  0xe3   : > { %716 = vmatpush2.msra.mxu0 %v567_v35  ;;  %v246_v27 = vadd.s32 128, %v245_v26  ;;  %v247_v28 = vand.u32 63, %v245_v26 }
  0xe4   : > { %v549_v33 = vpop.permute.xlu0 %548  ;;  %v551_v37 = vpop.permute.xlu1 %550 }
  0xe5   : > { %v566_v38 = vsel %vm564_vm6, %v549_v33, %v551_v37  ;;  %v248_v29 = vand.u32 63, %v246_v27  ;;  %vm249_vm9 = vcmp.ge.s32.totalorder %v247_v28, 4  ;;  %vm251_vm10 = vcmp.lt.s32.totalorder %v247_v28, 54 }
  0xe6   : > { %717 = vmatprep.subr.mxu0 %v566_v38  ;;  %vm253_vm13 = vmand %vm249_vm9, %vm251_vm10 }
  0xe7   : > { %vm250_vm11 = vcmp.ge.s32.totalorder %v248_v29, 4  ;;  %vm252_vm12 = vcmp.lt.s32.totalorder %v248_v29, 54 }
  0xe8   : > { %v547_v36 = vpop.permute.xlu0 %546  ;;  %v524_v41 = vpop.permute.xlu1 %523  ;;  %vm254_vm14 = vmand %vm250_vm11, %vm252_vm12 }
  0xe9   : > { %v565_v39 = vsel %vm564_vm6, %v547_v36, %v549_v33  ;;  %v2728_v33 = vsel %vm253_vm13, 1.0, %v2382_v6  ;;  %v2731_v37 = vsel %vm254_vm14, 1.0, %v2382_v6 }
  0xea   : > { %718 = vmatpush2.msra.mxu0 %v565_v39 }
  0xec   : > { %v2225_v40 = vpop.permute.xlu0 %2224  ;;  %v522_v46 = vpop.permute.xlu1 %521 }
  0xed   : > { %v2227_v42 = vunpack.i.h.bf16 %v2225_v40  ;;  %v2226_v43 = vunpack.i.l.bf16 %v2225_v40  ;;  %v532_v47 = vsel %vm527_vm7, %v522_v46, %v524_v41 }
  0xef   : > { %v533_v44 = vsel %vm527_vm7, %v524_v41, %v2226_v43 }
  0xf0   : > { %v518_v45 = vpop.permute.xlu0 %517  ;;  %719 = vmatprep.subr.mxu0 %v533_v44  ;;  %v516_v50 = vpop.permute.xlu1 %515 }
  0xf1   : > { %v531_v48 = vsel %vm527_vm7, %v518_v45, %v2227_v42  ;;  %720 = vmatpush2.msra.mxu0 %v532_v47  ;;  %v530_v51 = vsel %vm527_vm7, %v516_v50, %v518_v45 }
  0xf2   : > { %721 = vmatprep.subr.mxu0 %v531_v48 }
  0xf3   : > { %722 = vmatpush2.msra.mxu0 %v530_v51 }
  0xf4   : > { %v512_v49 = vpop.permute.xlu0 %511  ;;  %v514_v53 = vpop.permute.xlu1 %513 }
  0xf5   : > { %v529_v54 = vsel %vm527_vm7, %v512_v49, %v514_v53 }
  0xf6   : > { %723 = vmatprep.subr.mxu0 %v529_v54 }
  0xf8   : > { %v510_v52 = vpop.permute.xlu0 %509  ;;  %v487_v57 = vpop.permute.xlu1 %486 }
  0xf9   : > { %v528_v55 = vsel %vm527_vm7, %v510_v52, %v512_v49 }
  0xfa   : > { %724 = vmatpush2.msra.mxu0 %v528_v55 }
  0xfc   : > { %v2230_v56 = vpop.permute.xlu0 %2229  ;;  %v485_v62 = vpop.permute.xlu1 %484 }
  0xfd   : > { %v2232_v58 = vunpack.i.h.bf16 %v2230_v56  ;;  %v2231_v59 = vunpack.i.l.bf16 %v2230_v56  ;;  %v495_v63 = vsel %vm490_vm8, %v485_v62, %v487_v57 }
  0xff   : > { %v496_v60 = vsel %vm490_vm8, %v487_v57, %v2231_v59 }
 0x100   : > { %v481_v61 = vpop.permute.xlu0 %480  ;;  %725 = vmatprep.subr.mxu0 %v496_v60  ;;  %v479_v2 = vpop.permute.xlu1 %478 }
 0x101   : > { %v494_v0 = vsel %vm490_vm8, %v481_v61, %v2232_v58  ;;  %726 = vmatpush2.msra.mxu0 %v495_v63  ;;  %v493_v3 = vsel %vm490_vm8, %v479_v2, %v481_v61  ;;  %v1091_v63 = vld [vmem:[%s3726_s1 + $0x38] sm:$0xff] }
 0x102   : > { %727 = vmatprep.subr.mxu0 %v494_v0  ;;  %2101 = vmatprep.mubr.msk.f32.mxu1 %vm661_vm1, %v1091_v63 }
 0x103   : > { %728 = vmatpush2.msra.mxu0 %v493_v3 }
 0x104   : > { %v475_v1 = vpop.permute.xlu0 %474  ;;  %v477_v5 = vpop.permute.xlu1 %476 }
 0x105   : > { %v492_v7 = vsel %vm490_vm8, %v475_v1, %v477_v5 }
 0x106   : > { %729 = vmatprep.subr.mxu0 %v492_v7  ;;  %v1098_v7 = vld [vmem:[%s3727_s2 + $0x50] sm:$0xff] }
 0x108   : > { %v473_v4 = vpop.permute.xlu0 %472  ;;  %v450_v12 = vpop.permute.xlu1 %449 }
 0x109   : > { %v491_v8 = vsel %vm490_vm8, %v473_v4, %v475_v1  ;;  %v1096_v4 = vld [vmem:[%s3727_s2 + $0x30] sm:$0xff] }
 0x10a   : > { %730 = vmatpush2.msra.mxu0 %v491_v8 }
 0x10c   : > { %v2235_v9 = vpop.permute.xlu0 %2234 }
 0x10d   : > { %v2237_v10 = vunpack.i.h.bf16 %v2235_v9  ;;  %v2236_v11 = vunpack.i.l.bf16 %v2235_v9  ;;  %v448_v15 = vpop.permute.xlu1 %447  ;;  %v1097_v9 = vld [vmem:[%s3727_s2 + $0x40] sm:$0xff] }
 0x10e   : > { %v458_v17 = vsel %vm453_vm0, %v448_v15, %v450_v12 }
 0x10f   : > { %v459_v13 = vsel %vm453_vm0, %v450_v12, %v2236_v11 }
 0x110   : > { %731 = vmatprep.subr.mxu0 %v459_v13  ;;  %v444_v14 = vpop.permute.xlu0 %443 }
 0x111   : > { %v457_v16 = vsel %vm453_vm0, %v444_v14, %v2237_v10  ;;  %732 = vmatpush2.msra.mxu0 %v458_v17  ;;  %v442_v18 = vpop.permute.xlu1 %441 }
 0x112   : > { %733 = vmatprep.subr.mxu0 %v457_v16  ;;  %v456_v20 = vsel %vm453_vm0, %v442_v18, %v444_v14 }
 0x113   : > { %734 = vmatpush2.msra.mxu0 %v456_v20 }
 0x114   : > { %736 = vmatmul.mubr.f32.vlgmr.msra.gmra.mxu0 %v583_v19 }
 0x115   : > { %2099 = vmatprep.mubr.msk.f32.mxu0 %vm661_vm1, %v586_v21 }
 0x118   : > { %742 = vmatmul.mubr.f32.gmra.mxu0 %v585_v22 }
 0x119   : > { %2100 = vmatprep.mubr.msk.f32.mxu0 %vm661_vm1, %v588_v23 }
 0x11c   : > { %748 = vmatmul.mubr.f32.gmra.mxu0 %v587_v24 }
 0x11d   : > { %v649_v30 = vpop.permute.xlu0 %648 }
 0x11e   : > { %v659_v40 = vpop.permute.xlu1 %658 }
 0x121   : > { %v2831_v59 = vpop.permute.xlu0 %901 }
 0x122   : > { %v654_v42 = vpop.permute.xlu1 %653 }
 0x125   : > { %v2839_v61 = vpop.permute.xlu0 %865 }
 0x126   : > { %v951_v60 = vpop.permute.xlu1 %950 }
 0x129   : > { %v2852_v0 = vpop.permute.xlu0 %829 }
 0x12a   : > { %v2843_v62 = vpop.permute.xlu1 %2241 }
 0x12d   : > { %v2863_v2 = vpop.permute.xlu0 %793 }
 0x12e   : > { %v2857_v1 = vpop.permute.xlu1 %2246 }
 0x131   : > { %v2876_v5 = vpop.permute.xlu0 %2261 }
 0x132   : > { %v2867_v3 = vpop.permute.xlu1 %2251 }
 0x135   : > { %v2886_v10 = vpop.permute.xlu0 %2266 }
 0x136   : > { %v2881_v8 = vpop.permute.xlu1 %2256 }
 0x13a   : > { %v2888_v11 = vpop.permute.xlu1 %1058 }
 0x1d4   : > { %v737_v31 = vpop.f32.mrf.mxu0 }
 0x1d5   : > { %v738_v32 = vadd.f32 %v737_v31, %v649_v30 }
 0x1d6   : > { %v739_v34 = vpop.f32.mrf.mxu0 }
 0x1d7   : > { %v754_v35 = vmax.f32 %v738_v32, 0.0  ;;  %v740_v36 = vadd.f32 %v739_v34, %v649_v30 }
 0x1d8   : > { %v743_v43 = vpop.f32.mrf.mxu0 }
 0x1d9   : > { %v2734_v38 = vmul.f32 %v754_v35, %v2728_v33  ;;  %v755_v39 = vmax.f32 %v740_v36, 0.0  ;;  %v744_v44 = vadd.f32 %v743_v43, %v654_v42 }
 0x1da   : > { %v745_v46 = vpop.f32.mrf.mxu0 }
 0x1db   : > { %v2737_v41 = vmul.f32 %v755_v39, %v2731_v37  ;;  %946 = vrot.lane.b32.xlu0 %v2734_v38, %s2383_s9  ;;  %v756_v45 = vmax.f32 %v744_v44, 0.0  ;;  %v746_v47 = vadd.f32 %v745_v46, %v654_v42 }
 0x1dc   : > { %v749_v51 = vpop.f32.mrf.mxu0 }
 0x1dd   : > { %905 = vrot.lane.b32.xlu1 %v2737_v41, %s2384_s12  ;;  %v2756_v48 = vmul.f32 %v756_v45, %v2728_v33  ;;  %v757_v49 = vmax.f32 %v746_v47, 0.0  ;;  %v750_v52 = vadd.f32 %v749_v51, %v659_v40 }
 0x1de   : > { %v751_v55 = vpop.f32.mrf.mxu0 }
 0x1df   : > { %903 = vrot.lane.b32.xlu0 %v2734_v38, %s2384_s12  ;;  %v2767_v50 = vmul.f32 %v757_v49, %v2731_v37  ;;  %v758_v53 = vmax.f32 %v750_v52, 0.0  ;;  %v752_v56 = vadd.f32 %v751_v55, %v659_v40  ;;  %v2248_v55 = vunpack.i.l.bf16 %v2857_v1 }
 0x1e1   : > { %869 = vrot.lane.b32.xlu1 %v2737_v41, %s2385_s13  ;;  %v2786_v54 = vmul.f32 %v758_v53, %v2728_v33  ;;  %v759_v57 = vmax.f32 %v752_v56, 0.0 }
 0x1e3   : > { %867 = vrot.lane.b32.xlu0 %v2734_v38, %s2385_s13  ;;  %v2803_v58 = vmul.f32 %v759_v57, %v2731_v37 }
 0x1e5   : > { %833 = vrot.lane.b32.xlu1 %v2737_v41, %s2386_s14 }
 0x1e7   : > { %831 = vrot.lane.b32.xlu0 %v2734_v38, %s2386_s14 }
 0x1e9   : > { %797 = vrot.lane.b32.xlu1 %v2737_v41, %s2387_s20 }
 0x1eb   : > { %795 = vrot.lane.b32.xlu0 %v2734_v38, %s2387_s20 }
 0x1ed   : > { %1060 = vrot.lane.b32.xlu1 %v2756_v48, %s2388_s22 }
 0x1ef   : > { %1054 = vrot.lane.b32.xlu0 %v2734_v38, %s2388_s22 }
 0x1f1   : > { %1024 = vrot.lane.b32.xlu1 %v2756_v48, %s2389_s23 }
 0x1f3   : > { %948 = vrot.lane.b32.xlu0 %v2737_v41, %s2383_s9 }
 0x1f5   : > { %911 = vrot.lane.b32.xlu1 %v2767_v50, %s2384_s12 }
 0x1f7   : > { %1056 = vrot.lane.b32.xlu0 %v2737_v41, %s2388_s22 }
 0x1f9   : > { %875 = vrot.lane.b32.xlu1 %v2767_v50, %s2385_s13 }
 0x1fb   : > { %909 = vrot.lane.b32.xlu0 %v2756_v48, %s2384_s12 }
 0x1fd   : > { %839 = vrot.lane.b32.xlu1 %v2767_v50, %s2386_s14 }
 0x1ff   : > { %873 = vrot.lane.b32.xlu0 %v2756_v48, %s2385_s13 }
 0x201   : > { %803 = vrot.lane.b32.xlu1 %v2767_v50, %s2387_s20 }
 0x203   : > { %837 = vrot.lane.b32.xlu0 %v2756_v48, %s2386_s14 }
 0x205   : > { %915 = vrot.lane.b32.xlu1 %v2786_v54, %s2384_s12 }
 0x207   : > { %801 = vrot.lane.b32.xlu0 %v2756_v48, %s2387_s20 }
 0x209   : > { %879 = vrot.lane.b32.xlu1 %v2786_v54, %s2385_s13 }
 0x20b   : > { %1062 = vrot.lane.b32.xlu0 %v2767_v50, %s2388_s22 }
 0x20d   : > { %843 = vrot.lane.b32.xlu1 %v2786_v54, %s2386_s14 }
 0x20f   : > { %1026 = vrot.lane.b32.xlu0 %v2767_v50, %s2389_s23 }
 0x211   : > { %807 = vrot.lane.b32.xlu1 %v2786_v54, %s2387_s20 }
 0x213   : > { %917 = vrot.lane.b32.xlu0 %v2803_v58, %s2384_s12 }
 0x215   : > { %1066 = vrot.lane.b32.xlu1 %v2786_v54, %s2388_s22 }
 0x217   : > { %881 = vrot.lane.b32.xlu0 %v2803_v58, %s2385_s13 }
 0x219   : > { %1030 = vrot.lane.b32.xlu1 %v2786_v54, %s2389_s23 }
 0x21b   : > { %1020 = vrot.lane.b32.xlu0 %v2737_v41, %s2389_s23 }
 0x21d   : > { %1022 = vrot.lane.b32.xlu1 %v2382_v6, %s2389_s23 }
 0x21f   : > { %845 = vrot.lane.b32.xlu0 %v2803_v58, %s2386_s14 }
 0x221   : > { %994 = vrot.lane.b32.xlu1 %v2786_v54, %s2390_s27 }
 0x223   : > { %809 = vrot.lane.b32.xlu0 %v2803_v58, %s2387_s20 }
 0x225   : > { %988 = vrot.lane.b32.xlu1 %v2756_v48, %s2390_s27 }
 0x227   : > { %1018 = vrot.lane.b32.xlu0 %v2734_v38, %s2389_s23 }
 0x229   : > { %1068 = vrot.lane.b32.xlu1 %v2803_v58, %s2388_s22 }
 0x22b   : > { %2271 = vrot.lane.b32.xlu0 %v2382_v6, %s2390_s27 }
 0x22d   : > { %986 = vrot.lane.b32.xlu1 %v2382_v6, %s2390_s27 }
 0x22f   : > { %990 = vrot.lane.b32.xlu0 %v2767_v50, %s2390_s27 }
 0x231   : > { %1032 = vrot.lane.b32.xlu1 %v2803_v58, %s2389_s23 }
 0x233   : > { %984 = vrot.lane.b32.xlu0 %v2737_v41, %s2390_s27 }
 0x235   : > { %996 = vrot.lane.b32.xlu1 %v2803_v58, %s2390_s27 }
 0x237   : > { %982 = vrot.lane.b32.xlu0 %v2734_v38, %s2390_s27 }
 0x239   : > { %958 = vrot.lane.b32.xlu1 %v2786_v54, %s2383_s9 }
 0x23b   : > { %2276 = vrot.lane.b32.xlu0 %v2382_v6, %s2383_s9 }
 0x23d   : > { %960 = vrot.lane.b32.xlu1 %v2803_v58, %s2383_s9 }
 0x23f   : > { %954 = vrot.lane.b32.xlu0 %v2767_v50, %s2383_s9 }
 0x241   : > { %952 = vrot.lane.b32.xlu1 %v2756_v48, %s2383_s9 }
 0x243   : > { %1155 = vperm.xlu0 %2238, %v1096_v4  }
 0x245   : > { %1165 = vperm.xlu1 %2239, %v1098_v7  }
 0x247   : > { %1160 = vperm.xlu0 %2238, %v1097_v9  }
 0x249   : > { %1407 = vrot.lane.b32.xlu1 %v2382_v6, %s2384_s12 }
 0x24b   : > { %1456 = vrot.lane.b32.xlu0 %v2382_v6, %s2383_s9 }
 0x24d   : > { %v947_v12 = vpop.permute.xlu0 %946  ;;  %1371 = vrot.lane.b32.xlu1 %v2382_v6, %s2385_s13 }
 0x24f   : > { %v906_v13 = vpop.permute.xlu1 %905  ;;  %2281 = vrot.lane.b32.xlu0 %v2382_v6, %s2384_s12 }
 0x251   : > { %v904_v14 = vpop.permute.xlu0 %903  ;;  %1335 = vrot.lane.b32.xlu1 %v2382_v6, %s2386_s14 }
 0x252   : > { %v919_v57 = vsel %vm407_vm2, %v2831_v59, %v904_v14 }
 0x253   : > { %v2900_v15 = vpop.permute.xlu1 %869  ;;  %2286 = vrot.lane.b32.xlu0 %v2382_v6, %s2385_s13 }
 0x255   : > { %v2904_v16 = vpop.permute.xlu0 %867  ;;  %1299 = vrot.lane.b32.xlu1 %v2382_v6, %s2387_s20 }
 0x256   : > { %v884_v59 = vsel %vm370_vm3, %v2904_v16, %v2900_v15 }
 0x257   : > { %v2908_v17 = vpop.permute.xlu1 %833  ;;  %2291 = vrot.lane.b32.xlu0 %v2382_v6, %s2386_s14 }
 0x259   : > { %v2912_v18 = vpop.permute.xlu0 %831  ;;  %2301 = vrot.lane.b32.xlu1 %v2382_v6, %s2388_s22 }
 0x25b   : > { %v2916_v19 = vpop.permute.xlu1 %797  ;;  %2296 = vrot.lane.b32.xlu0 %v2382_v6, %s2387_s20 }
 0x25d   : > { %v2918_v20 = vpop.permute.xlu0 %795  ;;  %2306 = vrot.lane.b32.xlu1 %v2382_v6, %s2389_s23 }
 0x25f   : > { %v2920_v21 = vpop.permute.xlu1 %1060  ;;  %1564 = vrot.lane.b32.xlu0 %v2382_v6, %s2388_s22 }
 0x261   : > { %v2922_v22 = vpop.permute.xlu0 %1054 }
 0x263   : > { %v2924_v23 = vpop.permute.xlu1 %1024 }
 0x265   : > { %v949_v24 = vpop.permute.xlu0 %948 }
 0x266   : > { %v965_v26 = vsel %vm453_vm0, %v949_v24, %v951_v60  ;;  %v964_v27 = vsel %vm453_vm0, %v947_v12, %v949_v24  ;;  %v2249_v60 = vunpack.i.h.bf16 %v2857_v1  ;;  %v2253_v1 = vunpack.i.l.bf16 %v2867_v3 }
 0x267   : > { %v912_v28 = vpop.permute.xlu1 %911  ;;  %1177 = vmatprep.subr.mxu1 %v965_v26  ;;  %v2254_v24 = vunpack.i.h.bf16 %v2867_v3 }
 0x268   : > { %1178 = vmatpush1.msra.mxu1 %v964_v27 }
 0x269   : > { %1179 = vmatprep.subr.mxu1 %v2803_v58  ;;  %v2929_v29 = vpop.permute.xlu0 %1056 }
 0x26a   : > { %1180 = vmatpush1.msra.mxu1 %v2786_v54  ;;  %v920_v54 = vsel %vm407_vm2, %v904_v14, %v906_v13  ;;  %v883_v13 = vsel %vm370_vm3, %v2839_v61, %v2904_v16  ;;  %v848_v61 = vsel %vm333_vm4, %v2912_v18, %v2908_v17  ;;  %v2258_v16 = vunpack.i.l.bf16 %v2881_v8 }
 0x26b   : > { %v876_v30 = vpop.permute.xlu1 %875  ;;  %1181 = vmatprep.subr.mxu1 %v2767_v50 }
 0x26c   : > { %1182 = vmatpush1.msra.mxu1 %v2756_v48  ;;  %v2244_v48 = vunpack.i.h.bf16 %v2843_v62 }
 0x26d   : > { %1183 = vmatprep.subr.mxu1 %v2737_v41  ;;  %v910_v31 = vpop.permute.xlu0 %909  ;;  %v2243_v41 = vunpack.i.l.bf16 %v2843_v62 }
 0x26e   : > { %1184 = vmatpush1.msra.mxu1 %v2734_v38  ;;  %v922_v51 = vsel %vm407_vm2, %v910_v31, %v912_v28  ;;  %v921_v53 = vsel %vm407_vm2, %v2244_v48, %v910_v31  ;;  %v847_v31 = vsel %vm333_vm4, %v2852_v0, %v2912_v18  ;;  %v2263_v0 = vunpack.i.l.bf16 %v2876_v5 }
 0x26f   : > { %v840_v32 = vpop.permute.xlu1 %839 }
 0x271   : > { %v874_v34 = vpop.permute.xlu0 %873 }
 0x272   : > { %v886_v4 = vsel %vm370_vm3, %v874_v34, %v876_v30  ;;  %v885_v9 = vsel %vm370_vm3, %v2249_v60, %v874_v34  ;;  %v2259_v34 = vunpack.i.h.bf16 %v2881_v8  ;;  %v812_v8 = vsel %vm296_vm5, %v2918_v20, %v2916_v19 }
 0x273   : > { %v2936_v35 = vpop.permute.xlu1 %803 }
 0x275   : > { %v838_v36 = vpop.permute.xlu0 %837 }
 0x276   : > { %v850_v15 = vsel %vm333_vm4, %v838_v36, %v840_v32  ;;  %v849_v30 = vsel %vm333_vm4, %v2254_v24, %v838_v36  ;;  %v1090_v24 = vld [vmem:[%s3726_s1 + $0x30] sm:$0xff] }
 0x277   : > { %v916_v39 = vpop.permute.xlu1 %915 }
 0x278   : > { %v923_v50 = vsel %vm407_vm2, %v2243_v41, %v916_v39 }
 0x279   : > { %v2938_v40 = vpop.permute.xlu0 %801 }
 0x27a   : > { %v814_v17 = vsel %vm296_vm5, %v2938_v40, %v2936_v35  ;;  %v2264_v35 = vunpack.i.h.bf16 %v2876_v5  ;;  %v2268_v5 = vunpack.i.l.bf16 %v2886_v10 }
 0x27b   : > { %v880_v42 = vpop.permute.xlu1 %879 }
 0x27c   : > { %v887_v63 = vsel %vm370_vm3, %v2248_v55, %v880_v42 }
 0x27d   : > { %v2940_v43 = vpop.permute.xlu0 %1062 }
 0x27e   : > { %v1075_v19 = vsel %vm564_vm6, %v2940_v43, %v2264_v35 }
 0x27f   : > { %v844_v44 = vpop.permute.xlu1 %843 }
 0x280   : > { %v851_v27 = vsel %vm333_vm4, %v2253_v1, %v844_v44 }
 0x281   : > { %v2942_v45 = vpop.permute.xlu0 %1026 }
 0x283   : > { %v808_v46 = vpop.permute.xlu1 %807 }
 0x285   : > { %v918_v47 = vpop.permute.xlu0 %917 }
 0x286   : > { %v924_v38 = vsel %vm407_vm2, %v916_v39, %v918_v47  ;;  %v815_v39 = vsel %vm296_vm5, %v2258_v16, %v808_v46 }
 0x287   : > { %v2947_v49 = vpop.permute.xlu1 %1066  ;;  %1185 = vmatprep.subr.mxu1 %v924_v38 }
 0x288   : > { %1186 = vmatpush1.msra.mxu1 %v923_v50  ;;  %v2269_v50 = vunpack.i.h.bf16 %v2886_v10 }
 0x289   : > { %1187 = vmatprep.subr.mxu1 %v922_v51  ;;  %v882_v52 = vpop.permute.xlu0 %881 }
 0x28a   : > { %1188 = vmatpush1.msra.mxu1 %v921_v53  ;;  %v888_v58 = vsel %vm370_vm3, %v880_v42, %v882_v52 }
 0x28b   : > { %v2954_v56 = vpop.permute.xlu1 %1030  ;;  %1189 = vmatprep.subr.mxu1 %v920_v54 }
 0x28c   : > { %1190 = vmatpush1.msra.mxu1 %v919_v57 }
 0x28d   : > { %1191 = vmatprep.subr.mxu1 %v888_v58  ;;  %v2960_v62 = vpop.permute.xlu0 %1020 }
 0x28e   : > { %1192 = vmatpush1.msra.mxu1 %v887_v63 }
 0x28f   : > { %v2964_v7 = vpop.permute.xlu1 %1022  ;;  %1193 = vmatprep.subr.mxu1 %v886_v4 }
 0x290   : > { %1194 = vmatpush1.msra.mxu1 %v885_v9  ;;  %v1037_v53 = vsel %vm527_vm7, %v2960_v62, %v2964_v7 }
 0x291   : > { %1195 = vmatprep.subr.mxu1 %v884_v59  ;;  %v846_v12 = vpop.permute.xlu0 %845 }
 0x292   : > { %1196 = vmatpush1.msra.mxu1 %v883_v13  ;;  %v852_v14 = vsel %vm333_vm4, %v844_v44, %v846_v12  ;;  %v813_v44 = vsel %vm296_vm5, %v2259_v34, %v2938_v40 }
 0x293   : > { %v2976_v26 = vpop.permute.xlu1 %994  ;;  %1197 = vmatprep.subr.mxu1 %v852_v14 }
 0x294   : > { %1198 = vmatpush1.msra.mxu1 %v851_v27  ;;  %v1093_v27 = vld [vmem:[%s3726_s1 + $0x48] sm:$0xff] }
 0x295   : > { %1199 = vmatprep.subr.mxu1 %v850_v15  ;;  %v810_v28 = vpop.permute.xlu0 %809  ;;  %v1092_v15 = vld [vmem:[%s3726_s1 + $0x40] sm:$0xff] }
 0x296   : > { %1200 = vmatpush1.msra.mxu1 %v849_v30  ;;  %v816_v32 = vsel %vm296_vm5, %v808_v46, %v810_v28  ;;  %v811_v46 = vsel %vm296_vm5, %v2863_v2, %v2918_v20  ;;  %v1074_v2 = vsel %vm564_vm6, %v2920_v21, %v2940_v43  ;;  %v1073_v20 = vsel %vm564_vm6, %v2929_v29, %v2888_v11  ;;  %v1095_v28 = vld [vmem:[%s3726_s1 + $0x58] sm:$0xff]  ;;  %v1094_v30 = vld [vmem:[%s3726_s1 + $0x50] sm:$0xff] }
 0x297   : > { %v2985_v3 = vpop.permute.xlu1 %988  ;;  %1201 = vmatprep.subr.mxu1 %v848_v61  ;;  %v1039_v11 = vsel %vm527_vm7, %v2942_v45, %v2269_v50 }
 0x298   : > { %1202 = vmatpush1.msra.mxu1 %v847_v31 }
 0x299   : > { %1203 = vmatprep.subr.mxu1 %v816_v32  ;;  %v1019_v36 = vpop.permute.xlu0 %1018 }
 0x29a   : > { %1204 = vmatpush1.msra.mxu1 %v815_v39  ;;  %v1036_v55 = vsel %vm527_vm7, %v1019_v36, %v2960_v62 }
 0x29b   : > { %v1069_v42 = vpop.permute.xlu1 %1068  ;;  %1205 = vmatprep.subr.mxu1 %v814_v17 }
 0x29c   : > { %1206 = vmatpush1.msra.mxu1 %v813_v44  ;;  %v1077_v41 = vsel %vm564_vm6, %v1069_v42, %v2263_v0  ;;  %v1076_v40 = vsel %vm564_vm6, %v2947_v49, %v1069_v42  ;;  %v1072_v49 = vsel %vm564_vm6, %v2922_v22, %v2929_v29  ;;  %v1038_v22 = vsel %vm527_vm7, %v2924_v23, %v2942_v45 }
 0x29d   : > { %1207 = vmatprep.subr.mxu1 %v812_v8  ;;  %v2272_v18 = vpop.permute.xlu0 %2271 }
 0x29e   : > { %1208 = vmatpush1.msra.mxu1 %v811_v46  ;;  %v2274_v29 = vunpack.i.h.bf16 %v2272_v18  ;;  %v2273_v10 = vunpack.i.l.bf16 %v2272_v18 }
 0x29f   : > { %v987_v47 = vpop.permute.xlu1 %986  ;;  %1219 = vmatprep.subr.mxu1 %v1077_v41 }
 0x2a0   : > { %1220 = vmatpush2.msra.mxu1 %v1076_v40 }
 0x2a1   : > { %1221 = vmatprep.subr.mxu1 %v1075_v19  ;;  %v991_v38 = vpop.permute.xlu0 %990 }
 0x2a2   : > { %1222 = vmatpush2.msra.mxu1 %v1074_v2  ;;  %v1003_v45 = vsel %vm490_vm8, %v991_v38, %v2274_v29  ;;  %v1002_v60 = vsel %vm490_vm8, %v2985_v3, %v991_v38 }
 0x2a3   : > { %v1033_v48 = vpop.permute.xlu1 %1032  ;;  %1223 = vmatprep.subr.mxu1 %v1073_v20 }
 0x2a4   : > { %1224 = vmatpush2.msra.mxu1 %v1072_v49  ;;  %v1041_v51 = vsel %vm527_vm7, %v1033_v48, %v2268_v5  ;;  %v1040_v21 = vsel %vm527_vm7, %v2954_v56, %v1033_v48 }
 0x2a5   : > { %1225 = vmatprep.subr.mxu1 %v1041_v51  ;;  %v985_v43 = vpop.permute.xlu0 %984 }
 0x2a6   : > { %1226 = vmatpush2.msra.mxu1 %v1040_v21  ;;  %v1001_v62 = vsel %vm490_vm8, %v985_v43, %v987_v47 }
 0x2a7   : > { %v997_v52 = vpop.permute.xlu1 %996  ;;  %1227 = vmatprep.subr.mxu1 %v1039_v11 }
 0x2a8   : > { %1228 = vmatpush2.msra.mxu1 %v1038_v22  ;;  %v1005_v56 = vsel %vm490_vm8, %v997_v52, %v2273_v10  ;;  %v1004_v23 = vsel %vm490_vm8, %v2976_v26, %v997_v52  ;;  %v1808_v10 = vld [vmem:[%s3728_s3 + $0x170] sm:$0xff] }
 0x2a9   : > { %1229 = vmatprep.subr.mxu1 %v1037_v53  ;;  %v983_v54 = vpop.permute.xlu0 %982  ;;  %v1807_v53 = vld [vmem:[%s3728_s3 + $0x168] sm:$0xff] }
 0x2aa   : > { %1230 = vmatpush2.msra.mxu1 %v1036_v55  ;;  %v1000_v9 = vsel %vm490_vm8, %v983_v54, %v985_v43  ;;  %v1597_v43 = vld [vmem:[%s3726_s1 + $0x68] sm:$0xff]  ;;  %v1805_v54 = vld [vmem:[%s3728_s3 + $0x158] sm:$0xff]  ;;  %v1602_v55 = vld [vmem:[%s3727_s2 + $0x60] sm:$0xff] }
 0x2ab   : > { %v959_v57 = vpop.permute.xlu1 %958  ;;  %1231 = vmatprep.subr.mxu1 %v1005_v56  ;;  %2104 = vmatprep.mubr.msk.f32.mxu0 %vm661_vm1, %v1597_v43  ;;  %v1802_v56 = vld [vmem:[%s3728_s3 + $0x140] sm:$0xff]  ;;  %v1853_v43 = vld [vmem:[%s3728_s3 + $0x2d8] sm:$0xff] }
 0x2ac   : > { %1232 = vmatpush2.msra.mxu1 %v1004_v23  ;;  %v1801_v23 = vld [vmem:[%s3728_s3 + $0x138] sm:$0xff] }
 0x2ad   : > { %v2277_v58 = vpop.permute.xlu0 %2276  ;;  %1233 = vmatprep.subr.mxu1 %v1003_v45  ;;  %v1799_v45 = vld [vmem:[%s3728_s3 + $0x128] sm:$0xff] }
 0x2ae   : > { %v2279_v63 = vunpack.i.h.bf16 %v2277_v58  ;;  %v2278_v4 = vunpack.i.l.bf16 %v2277_v58  ;;  %1234 = vmatpush2.msra.mxu1 %v1002_v60  ;;  %v1798_v60 = vld [vmem:[%s3728_s3 + $0x120] sm:$0xff] }
 0x2af   : > { %v961_v7 = vpop.permute.xlu1 %960  ;;  %1235 = vmatprep.subr.mxu1 %v1001_v62  ;;  %v1793_v62 = vld [vmem:[%s3728_s3 + $0xf8] sm:$0xff] }
 0x2b0   : > { %1236 = vmatpush2.msra.mxu1 %v1000_v9  ;;  %v969_v59 = vsel %vm453_vm0, %v961_v7, %v2278_v4  ;;  %v968_v1 = vsel %vm453_vm0, %v959_v57, %v961_v7  ;;  %v1795_v4 = vld [vmem:[%s3728_s3 + $0x108] sm:$0xff]  ;;  %v1792_v9 = vld [vmem:[%s3728_s3 + $0xf0] sm:$0xff] }
 0x2b1   : > { %v955_v12 = vpop.permute.xlu0 %954  ;;  %1237 = vmatprep.subr.mxu1 %v969_v59  ;;  %v1790_v59 = vld [vmem:[%s3728_s3 + $0xe0] sm:$0xff] }
 0x2b2   : > { %1238 = vmatpush2.msra.mxu1 %v968_v1  ;;  %v967_v13 = vsel %vm453_vm0, %v955_v12, %v2279_v63  ;;  %v1796_v63 = vld [vmem:[%s3728_s3 + $0x110] sm:$0xff] }
 0x2b3   : > { %v953_v14 = vpop.permute.xlu1 %952  ;;  %1239 = vmatprep.subr.mxu1 %v967_v13  ;;  %v1787_v13 = vld [vmem:[%s3728_s3 + $0xc8] sm:$0xff] }
 0x2b4   : > { %v966_v26 = vsel %vm453_vm0, %v953_v14, %v955_v12  ;;  %v1789_v12 = vld [vmem:[%s3728_s3 + $0xd8] sm:$0xff]  ;;  %v1786_v14 = vld [vmem:[%s3728_s3 + $0xc0] sm:$0xff] }
 0x2b5   : > { %1240 = vmatpush2.msra.mxu1 %v966_v26 }
 0x2b6   : > { %1242 = vmatmul.mubr.f32.vlgmr.msra.gmra.mxu1 %v1090_v24  ;;  %1872 = vmatprep.subr.mxu1 %v1808_v10  ;;  %v1784_v24 = vld [vmem:[%s3728_s3 + $0xb0] sm:$0xff] }
 0x2b7   : > { %2102 = vmatprep.mubr.msk.f32.mxu1 %vm661_vm1, %v1093_v27  ;;  %1873 = vmatpush1.msra.mxu1 %v1807_v53  ;;  %v1783_v27 = vld [vmem:[%s3728_s3 + $0xa8] sm:$0xff]  ;;  %v1852_v53 = vld [vmem:[%s3728_s3 + $0x2d0] sm:$0xff] }
 0x2b8   : > { %1874 = vmatprep.subr.mxu1 %v1805_v54  ;;  %v1850_v54 = vld [vmem:[%s3728_s3 + $0x2c0] sm:$0xff] }
 0x2ba   : > { %1248 = vmatmul.mubr.f32.gmra.mxu1 %v1092_v15  ;;  %v1781_v15 = vld [vmem:[%s3728_s3 + $0x98] sm:$0xff] }
 0x2bb   : > { %2103 = vmatprep.mubr.msk.f32.mxu1 %vm661_vm1, %v1095_v28 }
 0x2be   : > { %1254 = vmatmul.mubr.f32.gmra.mxu1 %v1094_v30  ;;  %v1156_v61 = vpop.permute.xlu0 %1155  ;;  %v1780_v30 = vld [vmem:[%s3728_s3 + $0x90] sm:$0xff] }
 0x2c0   : > { %v1166_v19 = vpop.permute.xlu1 %1165 }
 0x2c2   : > { %v1161_v44 = vpop.permute.xlu0 %1160 }
 0x2c6   : > { %v3172_v50 = vpop.permute.xlu0 %1456 }
 0x2ca   : > { %v3182_v21 = vpop.permute.xlu0 %2281 }
 0x2ce   : > { %v3196_v52 = vpop.permute.xlu0 %2286 }
 0x2d2   : > { %v3206_v29 = vpop.permute.xlu0 %2291 }
 0x2d6   : > { %v3238_v58 = vpop.permute.xlu0 %2296 }
 0x2da   : > { %v3260_v1 = vpop.permute.xlu0 %1564 }
 0x376   : > { %v1243_v16 = vpop.f32.mrf.mxu1 }
 0x377   : > { %v1244_v3 = vadd.f32 %v1243_v16, %v1156_v61 }
 0x378   : > { %v1245_v31 = vpop.f32.mrf.mxu1 }
 0x379   : > { %v1260_v32 = vmax.f32 %v1244_v3, 0.0  ;;  %v1246_v34 = vadd.f32 %v1245_v31, %v1156_v61  ;;  %v1778_v61 = vld [vmem:[%s3728_s3 + $0x80] sm:$0xff]  ;;  %v1777_v3 = vld [vmem:[%s3728_s3 + $0x78] sm:$0xff]  ;;  %v1775_v31 = vld [vmem:[%s3728_s3 + $0x68] sm:$0xff] }
 0x37a   : > { %v1249_v42 = vpop.f32.mrf.mxu1 }
 0x37b   : > { %v3071_v36 = vmul.f32 %v1260_v32, %v2728_v33  ;;  %v1261_v39 = vmax.f32 %v1246_v34, 0.0  ;;  %v1250_v0 = vadd.f32 %v1249_v42, %v1161_v44  ;;  %v1774_v34 = vld [vmem:[%s3728_s3 + $0x60] sm:$0xff] }
 0x37c   : > { %v1251_v18 = vpop.f32.mrf.mxu1 }
 0x37d   : > { %v3074_v17 = vmul.f32 %v1261_v39, %v2731_v37  ;;  %1452 = vrot.lane.b32.xlu1 %v3071_v36, %s2383_s9  ;;  %v1262_v8 = vmax.f32 %v1250_v0, 0.0  ;;  %v1252_v35 = vadd.f32 %v1251_v18, %v1161_v44  ;;  %v1772_v39 = vld [vmem:[%s3728_s3 + $0x50] sm:$0xff]  ;;  %v1771_v44 = vld [vmem:[%s3728_s3 + $0x48] sm:$0xff]  ;;  %v1769_v0 = vld [vmem:[%s3728_s3 + $0x38] sm:$0xff] }
 0x37e   : > { %v1255_v40 = vpop.f32.mrf.mxu1  ;;  %v1768_v18 = vld [vmem:[%s3728_s3 + $0x30] sm:$0xff] }
 0x37f   : > { %1411 = vrot.lane.b32.xlu0 %v3074_v17, %s2384_s12  ;;  %v3093_v46 = vmul.f32 %v1262_v8, %v2728_v33  ;;  %v1263_v41 = vmax.f32 %v1252_v35, 0.0  ;;  %v1256_v38 = vadd.f32 %v1255_v40, %v1166_v19  ;;  %v1766_v35 = vld [vmem:[%s3728_s3 + $0x20] sm:$0xff]  ;;  %v1765_v40 = vld [vmem:[%s3728_s3 + $0x18] sm:$0xff] }
 0x380   : > { %v1257_v20 = vpop.f32.mrf.mxu1 }
 0x381   : > { %1409 = vrot.lane.b32.xlu1 %v3071_v36, %s2384_s12  ;;  %v3104_v47 = vmul.f32 %v1263_v41, %v2731_v37  ;;  %v1264_v2 = vmax.f32 %v1256_v38, 0.0  ;;  %v1258_v48 = vadd.f32 %v1257_v20, %v1166_v19  ;;  %v1763_v19 = vld [vmem:[%s3728_s3 + $0x8] sm:$0xff]  ;;  %v1856_v20 = vld [vmem:[%s3728_s3 + $0x2f0] sm:$0xff] }
 0x383   : > { %1375 = vrot.lane.b32.xlu0 %v3074_v17, %s2385_s13  ;;  %v3123_v5 = vmul.f32 %v1264_v2, %v2728_v33  ;;  %v1265_v49 = vmax.f32 %v1258_v48, 0.0  ;;  %v1762_v2 = vld [vmem:[%s3728_s3] sm:$0xff] }
 0x385   : > { %1373 = vrot.lane.b32.xlu1 %v3071_v36, %s2385_s13  ;;  %v3140_v33 = vmul.f32 %v1265_v49, %v2731_v37  ;;  %v3168_v37 = vpop.permute.xlu1 %1407  ;;  %v1855_v49 = vld [vmem:[%s3728_s3 + $0x2e8] sm:$0xff] }
 0x387   : > { %1339 = vrot.lane.b32.xlu0 %v3074_v17, %s2386_s14 }
 0x389   : > { %1337 = vrot.lane.b32.xlu1 %v3071_v36, %s2386_s14  ;;  %v3178_v51 = vpop.permute.xlu1 %1371 }
 0x38b   : > { %1303 = vrot.lane.b32.xlu0 %v3074_v17, %s2387_s20 }
 0x38d   : > { %1301 = vrot.lane.b32.xlu1 %v3071_v36, %s2387_s20  ;;  %v3191_v11 = vpop.permute.xlu1 %1335 }
 0x38f   : > { %1566 = vrot.lane.b32.xlu0 %v3093_v46, %s2388_s22 }
 0x391   : > { %1560 = vrot.lane.b32.xlu1 %v3071_v36, %s2388_s22  ;;  %v3202_v22 = vpop.permute.xlu1 %1299 }
 0x393   : > { %1530 = vrot.lane.b32.xlu0 %v3093_v46, %s2389_s23 }
 0x395   : > { %1454 = vrot.lane.b32.xlu1 %v3074_v17, %s2383_s9  ;;  %v3230_v57 = vpop.permute.xlu1 %2301 }
 0x397   : > { %1417 = vrot.lane.b32.xlu0 %v3104_v47, %s2384_s12 }
 0x399   : > { %1562 = vrot.lane.b32.xlu1 %v3074_v17, %s2388_s22  ;;  %v3252_v7 = vpop.permute.xlu1 %2306 }
 0x39b   : > { %1381 = vrot.lane.b32.xlu0 %v3104_v47, %s2385_s13 }
 0x39d   : > { %1415 = vrot.lane.b32.xlu1 %v3093_v46, %s2384_s12 }
 0x39f   : > { %1345 = vrot.lane.b32.xlu0 %v3104_v47, %s2386_s14 }
 0x3a1   : > { %1379 = vrot.lane.b32.xlu1 %v3093_v46, %s2385_s13 }
 0x3a3   : > { %1309 = vrot.lane.b32.xlu0 %v3104_v47, %s2387_s20 }
 0x3a5   : > { %1343 = vrot.lane.b32.xlu1 %v3093_v46, %s2386_s14 }
 0x3a7   : > { %1421 = vrot.lane.b32.xlu0 %v3123_v5, %s2384_s12 }
 0x3a9   : > { %1307 = vrot.lane.b32.xlu1 %v3093_v46, %s2387_s20 }
 0x3ab   : > { %1385 = vrot.lane.b32.xlu0 %v3123_v5, %s2385_s13 }
 0x3ad   : > { %1568 = vrot.lane.b32.xlu1 %v3104_v47, %s2388_s22 }
 0x3af   : > { %1349 = vrot.lane.b32.xlu0 %v3123_v5, %s2386_s14 }
 0x3b1   : > { %1532 = vrot.lane.b32.xlu1 %v3104_v47, %s2389_s23 }
 0x3b3   : > { %1313 = vrot.lane.b32.xlu0 %v3123_v5, %s2387_s20 }
 0x3b5   : > { %1423 = vrot.lane.b32.xlu1 %v3140_v33, %s2384_s12 }
 0x3b7   : > { %1572 = vrot.lane.b32.xlu0 %v3123_v5, %s2388_s22 }
 0x3b9   : > { %1387 = vrot.lane.b32.xlu1 %v3140_v33, %s2385_s13 }
 0x3bb   : > { %1536 = vrot.lane.b32.xlu0 %v3123_v5, %s2389_s23 }
 0x3bd   : > { %1526 = vrot.lane.b32.xlu1 %v3074_v17, %s2389_s23 }
 0x3bf   : > { %1528 = vrot.lane.b32.xlu0 %v2382_v6, %s2389_s23 }
 0x3c1   : > { %1351 = vrot.lane.b32.xlu1 %v3140_v33, %s2386_s14 }
 0x3c3   : > { %1500 = vrot.lane.b32.xlu0 %v3123_v5, %s2390_s27 }
 0x3c5   : > { %1315 = vrot.lane.b32.xlu1 %v3140_v33, %s2387_s20  ;;  %s2108_s20 = sshll.u32 %s2091_s19, 4  ;;  %s2326_s19 = scalar_lea.vmem %s2325_s28, 32 }
 0x3c6   : > { %s2029_s6 = scalar_lea.hbm %s3729_s4, %s2108_s20 }
 0x3c7   : > { %1494 = vrot.lane.b32.xlu0 %v3093_v46, %s2390_s27 }
 0x3c9   : > { %1524 = vrot.lane.b32.xlu1 %v3071_v36, %s2389_s23 }
 0x3cb   : > { %1574 = vrot.lane.b32.xlu0 %v3140_v33, %s2388_s22  ;;  %s224_s22 = scalar_lea.vmem [#allocation5], %s2475_s8 }
 0x3cd   : > { %2311 = vrot.lane.b32.xlu1 %v2382_v6, %s2390_s27 }
 0x3cf   : > { %1492 = vrot.lane.b32.xlu0 %v2382_v6, %s2390_s27 }
 0x3d1   : > { %1496 = vrot.lane.b32.xlu1 %v3104_v47, %s2390_s27 }
 0x3d3   : > { %1538 = vrot.lane.b32.xlu0 %v3140_v33, %s2389_s23 }
 0x3d5   : > { %1490 = vrot.lane.b32.xlu1 %v3074_v17, %s2390_s27 }
 0x3d7   : > { %1502 = vrot.lane.b32.xlu0 %v3140_v33, %s2390_s27 }
 0x3d9   : > { %1488 = vrot.lane.b32.xlu1 %v3071_v36, %s2390_s27 }
 0x3db   : > { %1464 = vrot.lane.b32.xlu0 %v3123_v5, %s2383_s9 }
 0x3dd   : > { %2316 = vrot.lane.b32.xlu1 %v2382_v6, %s2383_s9  ;;  %v1804_v6 = vld [vmem:[%s3728_s3 + $0x150] sm:$0xff] }
 0x3de   : > { %1875 = vmatpush1.msra.mxu1 %v1804_v6 }
 0x3df   : > { %1466 = vrot.lane.b32.xlu0 %v3140_v33, %s2383_s9  ;;  %1876 = vmatprep.subr.mxu1 %v1802_v56  ;;  %v1847_v56 = vld [vmem:[%s3728_s3 + $0x2a8] sm:$0xff] }
 0x3e0   : > { %1877 = vmatpush1.msra.mxu1 %v1801_v23 }
 0x3e1   : > { %1460 = vrot.lane.b32.xlu1 %v3104_v47, %s2383_s9  ;;  %1878 = vmatprep.subr.mxu1 %v1799_v45  ;;  %v1846_v45 = vld [vmem:[%s3728_s3 + $0x2a0] sm:$0xff] }
 0x3e2   : > { %1879 = vmatpush1.msra.mxu1 %v1798_v60  ;;  %v1844_v60 = vld [vmem:[%s3728_s3 + $0x290] sm:$0xff] }
 0x3e3   : > { %1458 = vrot.lane.b32.xlu0 %v3093_v46, %s2383_s9  ;;  %1880 = vmatprep.subr.mxu1 %v1796_v63  ;;  %s2031_s9 = sshll.u32 %s224_s22, 4  ;;  %s2032_s9 = int_to_ptr.vmem [resolvable:$true] %s2031_s9 }
 0x3e4   : > { %1881 = vmatpush1.msra.mxu1 %v1795_v4  ;;  %v1843_v4 = vld [vmem:[%s3728_s3 + $0x288] sm:$0xff]  ;;  %s2320_s10 = scalar_lea.vmem %s2032_s9, 16  ;;  %p2327_p2 = scmp.lt.s32.totalorder %s2032_s9, %s2325_s28 }
 0x3e5   : > { %1661 = vperm.xlu1 %2239, %v1602_v55   ;;  %1882 = vmatprep.subr.mxu1 %v1793_v62  ;;  %v1849_v55 = vld [vmem:[%s3728_s3 + $0x2b8] sm:$0xff]  ;;  %p2321_p13 = scmp.ne.s32.totalorder %s2032_s9, %s2320_s10  ;;  %p2328_p3 = scmp.lt.s32.totalorder %s2326_s19, %s2320_s10 }
 0x3e6   : > { %1883 = vmatpush1.msra.mxu1 %v1792_v9 }
 0x3e7   : > { %1884 = vmatprep.subr.mxu1 %v1790_v59  ;;  %v1841_v59 = vld [vmem:[%s3728_s3 + $0x278] sm:$0xff]  ;;  %p2322_p0 = pnand %p2321_p13, %p2456_p6  ;;  %p2329_p4 = por %p2328_p3, %p2327_p2 }
 0x3e8   : > { %1885 = vmatpush1.msra.mxu1 %v1789_v12 }
 0x3e9   : > { %1886 = vmatprep.subr.mxu1 %v1787_v13  ;;  %v1840_v13 = vld [vmem:[%s3728_s3 + $0x270] sm:$0xff]  ;;  %p2323_p1 = pneg %p2322_p0 }
 0x3ea   : > { %1887 = vmatpush1.msra.mxu1 %v1786_v14  ;;  %v1838_v14 = vld [vmem:[%s3728_s3 + $0x260] sm:$0xff] }
 0x3eb   : > { %1888 = vmatprep.subr.mxu1 %v1784_v24  ;;  %v1837_v24 = vld [vmem:[%s3728_s3 + $0x258] sm:$0xff]  ;;  %p2330_p5 = pnand %p2329_p4, %p2323_p1 }
 0x3ec   : > { %1889 = vmatpush1.msra.mxu1 %v1783_v27 }
 0x3ed   : > { %1890 = vmatprep.subr.mxu1 %v1781_v15 }
 0x3ee   : > { %1891 = vmatpush1.msra.mxu1 %v1780_v30 }
 0x3ef   : > { %v3274_v26 = vpop.permute.xlu1 %1452  ;;  %1892 = vmatprep.subr.mxu1 %v1778_v61  ;;  %v1826_v61 = vld [vmem:[%s3728_s3 + $0x200] sm:$0xff] }
 0x3f0   : > { %1893 = vmatpush1.msra.mxu1 %v1777_v3 }
 0x3f1   : > { %v3282_v28 = vpop.permute.xlu0 %1411  ;;  %1894 = vmatprep.subr.mxu1 %v1775_v31  ;;  %v1823_v31 = vld [vmem:[%s3728_s3 + $0x1e8] sm:$0xff] }
 0x3f2   : > { %1895 = vmatpush1.msra.mxu1 %v1774_v34 }
 0x3f3   : > { %v3290_v16 = vpop.permute.xlu1 %1409  ;;  %1896 = vmatprep.subr.mxu1 %v1772_v39  ;;  %v1822_v39 = vld [vmem:[%s3728_s3 + $0x1e0] sm:$0xff] }
 0x3f4   : > { %1897 = vmatpush1.msra.mxu1 %v1771_v44 }
 0x3f5   : > { %v3298_v32 = vpop.permute.xlu0 %1375  ;;  %1898 = vmatprep.subr.mxu1 %v1769_v0 }
 0x3f6   : > { %1899 = vmatpush1.msra.mxu1 %v1768_v18 }
 0x3f7   : > { %v3306_v42 = vpop.permute.xlu1 %1373  ;;  %1900 = vmatprep.subr.mxu1 %v1766_v35 }
 0x3f8   : > { %1901 = vmatpush1.msra.mxu1 %v1765_v40 }
 0x3f9   : > { %v3314_v8 = vpop.permute.xlu0 %1339  ;;  %1902 = vmatprep.subr.mxu1 %v1763_v19 }
 0x3fa   : > { %1903 = vmatpush1.msra.mxu1 %v1762_v2 }
 0x3fb   : > { %v3322_v41 = vpop.permute.xlu1 %1337  ;;  %1904 = vmatprep.subr.mxu1 %v1856_v20 }
 0x3fc   : > { %1905 = vmatpush2.msra.mxu1 %v1855_v49  ;;  %v2283_v49 = vunpack.i.l.bf16 %v3182_v21 }
 0x3fd   : > { %v3330_v38 = vpop.permute.xlu0 %1303  ;;  %1906 = vmatprep.subr.mxu1 %v1853_v43 }
 0x3fe   : > { %1907 = vmatpush2.msra.mxu1 %v1852_v53 }
 0x3ff   : > { %v3338_v48 = vpop.permute.xlu1 %1301  ;;  %1908 = vmatprep.subr.mxu1 %v1850_v54  ;;  %v2284_v54 = vunpack.i.h.bf16 %v3182_v21  ;;  %v1425_v21 = vsel %vm407_vm2, %v3168_v37, %v3290_v16 }
 0x400   : > { %1909 = vmatpush2.msra.mxu1 %v1849_v55 }
 0x401   : > { %v3346_v10 = vpop.permute.xlu0 %1566  ;;  %1910 = vmatprep.subr.mxu1 %v1847_v56 }
 0x402   : > { %1911 = vmatpush2.msra.mxu1 %v1846_v45 }
 0x403   : > { %v3354_v6 = vpop.permute.xlu1 %1560  ;;  %1912 = vmatprep.subr.mxu1 %v1844_v60 }
 0x404   : > { %1913 = vmatpush2.msra.mxu1 %v1843_v4  ;;  %v1426_v4 = vsel %vm407_vm2, %v3290_v16, %v3282_v28  ;;  %v1390_v16 = vsel %vm370_vm3, %v3306_v42, %v3298_v32 }
 0x405   : > { %v3362_v23 = vpop.permute.xlu0 %1530  ;;  %1914 = vmatprep.subr.mxu1 %v1841_v59 }
 0x406   : > { %1915 = vmatpush2.msra.mxu1 %v1840_v13 }
 0x407   : > { %v1455_v63 = vpop.permute.xlu1 %1454  ;;  %1916 = vmatprep.subr.mxu1 %v1838_v14 }
 0x408   : > { %v1470_v62 = vsel %vm453_vm0, %v3274_v26, %v1455_v63  ;;  %v1471_v9 = vsel %vm453_vm0, %v1455_v63, %v3172_v50  ;;  %v1835_v26 = vld [vmem:[%s3728_s3 + $0x248] sm:$0xff]  ;;  %1917 = vmatpush2.msra.mxu1 %v1837_v24 }
 0x409   : > { %v1418_v12 = vpop.permute.xlu0 %1417  ;;  %1681 = vmatprep.subr.mxu0 %v1471_v9  ;;  %1918 = vmatprep.subr.mxu1 %v1835_v26  ;;  %v1389_v26 = vsel %vm370_vm3, %v3178_v51, %v3306_v42  ;;  %v1354_v42 = vsel %vm333_vm4, %v3322_v41, %v3314_v8 }
 0x40a   : > { %1682 = vmatpush1.msra.mxu0 %v1470_v62  ;;  %v2288_v62 = vunpack.i.l.bf16 %v3196_v52 }
 0x40b   : > { %1683 = vmatprep.subr.mxu0 %v3140_v33  ;;  %v3387_v50 = vpop.permute.xlu1 %1562  ;;  %v1834_v33 = vld [vmem:[%s3728_s3 + $0x240] sm:$0xff] }
 0x40c   : > { %1684 = vmatpush1.msra.mxu0 %v3123_v5  ;;  %v1832_v5 = vld [vmem:[%s3728_s3 + $0x230] sm:$0xff]  ;;  %1919 = vmatpush2.msra.mxu1 %v1834_v33 }
 0x40d   : > { %v3396_v27 = vpop.permute.xlu0 %1381  ;;  %1685 = vmatprep.subr.mxu0 %v3104_v47  ;;  %v1831_v47 = vld [vmem:[%s3728_s3 + $0x228] sm:$0xff]  ;;  %1920 = vmatprep.subr.mxu1 %v1832_v5  ;;  %v2294_v5 = vunpack.i.h.bf16 %v3206_v29 }
 0x40e   : > { %1686 = vmatpush1.msra.mxu0 %v3093_v46  ;;  %v1829_v46 = vld [vmem:[%s3728_s3 + $0x218] sm:$0xff]  ;;  %1921 = vmatpush2.msra.mxu1 %v1831_v47 }
 0x40f   : > { %1687 = vmatprep.subr.mxu0 %v3074_v17  ;;  %v1416_v15 = vpop.permute.xlu1 %1415  ;;  %v1828_v17 = vld [vmem:[%s3728_s3 + $0x210] sm:$0xff]  ;;  %1922 = vmatprep.subr.mxu1 %v1829_v46 }
 0x410   : > { %1688 = vmatpush1.msra.mxu0 %v3071_v36  ;;  %v1825_v36 = vld [vmem:[%s3728_s3 + $0x1f8] sm:$0xff]  ;;  %1923 = vmatpush2.msra.mxu1 %v1828_v17  ;;  %v1428_v45 = vsel %vm407_vm2, %v1416_v15, %v1418_v12  ;;  %v1427_v60 = vsel %vm407_vm2, %v2284_v54, %v1416_v15  ;;  %v2289_v12 = vunpack.i.h.bf16 %v3196_v52  ;;  %v2293_v52 = vunpack.i.l.bf16 %v3206_v29 }
 0x411   : > { %v3414_v30 = vpop.permute.xlu0 %1345  ;;  %1924 = vmatprep.subr.mxu1 %v1826_v61  ;;  %v2298_v29 = vunpack.i.l.bf16 %v3238_v58  ;;  %v1353_v17 = vsel %vm333_vm4, %v3191_v11, %v3322_v41  ;;  %v2303_v41 = vunpack.i.l.bf16 %v3230_v57 }
 0x412   : > { %1925 = vmatpush2.msra.mxu1 %v1825_v36 }
 0x413   : > { %v1380_v3 = vpop.permute.xlu1 %1379  ;;  %1926 = vmatprep.subr.mxu1 %v1823_v31 }
 0x414   : > { %1927 = vmatpush2.msra.mxu1 %v1822_v39  ;;  %v1392_v28 = vsel %vm370_vm3, %v1380_v3, %v3396_v27  ;;  %v1391_v24 = vsel %vm370_vm3, %v2289_v12, %v1380_v3  ;;  %v2299_v3 = vunpack.i.h.bf16 %v3238_v58  ;;  %v1318_v58 = vsel %vm296_vm5, %v3338_v48, %v3330_v38 }
 0x415   : > { %v3428_v34 = vpop.permute.xlu0 %1309 }
 0x417   : > { %v1344_v44 = vpop.permute.xlu1 %1343 }
 0x418   : > { %v1356_v32 = vsel %vm333_vm4, %v1344_v44, %v3414_v30  ;;  %v1355_v46 = vsel %vm333_vm4, %v2294_v5, %v1344_v44  ;;  %v1317_v44 = vsel %vm296_vm5, %v3202_v22, %v3338_v48  ;;  %v1819_v5 = vld [vmem:[%s3728_s3 + $0x1c8] sm:$0xff] }
 0x419   : > { %v1422_v0 = vpop.permute.xlu0 %1421 }
 0x41a   : > { %v1429_v55 = vsel %vm407_vm2, %v2283_v49, %v1422_v0  ;;  %v1578_v49 = vsel %vm564_vm6, %v3354_v6, %v3387_v50 }
 0x41b   : > { %v3433_v18 = vpop.permute.xlu1 %1307 }
 0x41c   : > { %v1320_v8 = vsel %vm296_vm5, %v3433_v18, %v3428_v34  ;;  %v1319_v39 = vsel %vm296_vm5, %v2299_v3, %v3433_v18  ;;  %v2304_v34 = vunpack.i.h.bf16 %v3230_v57  ;;  %v2308_v57 = vunpack.i.l.bf16 %v3252_v7  ;;  %v1851_v3 = vld [vmem:[%s3728_s3 + $0x2c8] sm:$0xff] }
 0x41d   : > { %v1386_v35 = vpop.permute.xlu0 %1385 }
 0x41e   : > { %v1393_v13 = vsel %vm370_vm3, %v2288_v62, %v1386_v35 }
 0x41f   : > { %v3435_v40 = vpop.permute.xlu1 %1568 }
 0x420   : > { %v1581_v38 = vsel %vm564_vm6, %v3435_v40, %v2304_v34  ;;  %v1580_v22 = vsel %vm564_vm6, %v3346_v10, %v3435_v40  ;;  %v1839_v34 = vld [vmem:[%s3728_s3 + $0x268] sm:$0xff] }
 0x421   : > { %v1350_v19 = vpop.permute.xlu0 %1349 }
 0x422   : > { %v1357_v15 = vsel %vm333_vm4, %v2293_v52, %v1350_v19 }
 0x423   : > { %v3437_v2 = vpop.permute.xlu1 %1532 }
 0x424   : > { %v1544_v6 = vsel %vm527_vm7, %v3362_v23, %v3437_v2 }
 0x425   : > { %v1314_v20 = vpop.permute.xlu0 %1313 }
 0x426   : > { %v1321_v36 = vsel %vm296_vm5, %v2298_v29, %v1314_v20  ;;  %v1857_v29 = vld [vmem:[%s3728_s3 + $0x2f8] sm:$0xff] }
 0x427   : > { %v1424_v43 = vpop.permute.xlu1 %1423 }
 0x428   : > { %v1430_v53 = vsel %vm407_vm2, %v1422_v0, %v1424_v43 }
 0x429   : > { %v3443_v56 = vpop.permute.xlu0 %1572  ;;  %1689 = vmatprep.subr.mxu0 %v1430_v53  ;;  %v2309_v53 = vunpack.i.h.bf16 %v3252_v7 }
 0x42a   : > { %1690 = vmatpush1.msra.mxu0 %v1429_v55 }
 0x42b   : > { %1691 = vmatprep.subr.mxu0 %v1428_v45  ;;  %v1388_v63 = vpop.permute.xlu1 %1387 }
 0x42c   : > { %1692 = vmatpush1.msra.mxu0 %v1427_v60  ;;  %v1394_v59 = vsel %vm370_vm3, %v1386_v35, %v1388_v63 }
 0x42d   : > { %v3454_v9 = vpop.permute.xlu0 %1536  ;;  %1693 = vmatprep.subr.mxu0 %v1426_v4 }
 0x42e   : > { %1694 = vmatpush1.msra.mxu0 %v1425_v21 }
 0x42f   : > { %1695 = vmatprep.subr.mxu0 %v1394_v59  ;;  %v3459_v14 = vpop.permute.xlu1 %1526 }
 0x430   : > { %1696 = vmatpush1.msra.mxu0 %v1393_v13 }
 0x431   : > { %v3464_v37 = vpop.permute.xlu0 %1528  ;;  %1697 = vmatprep.subr.mxu0 %v1392_v28 }
 0x432   : > { %1698 = vmatpush1.msra.mxu0 %v1391_v24 }
 0x433   : > { %1699 = vmatprep.subr.mxu0 %v1390_v16  ;;  %v1352_v33 = vpop.permute.xlu1 %1351 }
 0x434   : > { %1700 = vmatpush1.msra.mxu0 %v1389_v26  ;;  %v1358_v27 = vsel %vm333_vm4, %v1350_v19, %v1352_v33  ;;  %v1596_v26 = vld [vmem:[%s3726_s1 + $0x60] sm:$0xff] }
 0x435   : > { %v3476_v47 = vpop.permute.xlu0 %1500  ;;  %1701 = vmatprep.subr.mxu0 %v1358_v27  ;;  %v1820_v27 = vld [vmem:[%s3728_s3 + $0x1d0] sm:$0xff] }
 0x436   : > { %1702 = vmatpush1.msra.mxu0 %v1357_v15  ;;  %1928 = vmatprep.subr.mxu1 %v1820_v27  ;;  %v1817_v15 = vld [vmem:[%s3728_s3 + $0x1b8] sm:$0xff] }
 0x437   : > { %1703 = vmatprep.subr.mxu0 %v1356_v32  ;;  %v1316_v51 = vpop.permute.xlu1 %1315  ;;  %1929 = vmatpush2.msra.mxu1 %v1819_v5  ;;  %v1814_v32 = vld [vmem:[%s3728_s3 + $0x1a0] sm:$0xff] }
 0x438   : > { %1704 = vmatpush1.msra.mxu0 %v1355_v46  ;;  %v1322_v30 = vsel %vm296_vm5, %v1314_v20, %v1316_v51  ;;  %v1579_v20 = vsel %vm564_vm6, %v3387_v50, %v3260_v1  ;;  %v1545_v1 = vsel %vm527_vm7, %v3437_v2, %v2309_v53  ;;  %1930 = vmatprep.subr.mxu1 %v1817_v15  ;;  %v1813_v46 = vld [vmem:[%s3728_s3 + $0x198] sm:$0xff]  ;;  %v1811_v51 = vld [vmem:[%s3728_s3 + $0x188] sm:$0xff]  ;;  %v1776_v53 = vld [vmem:[%s3728_s3 + $0x70] sm:$0xff] }
 0x439   : > { %v1495_v61 = vpop.permute.xlu0 %1494  ;;  %1705 = vmatprep.subr.mxu0 %v1354_v42  ;;  %v1810_v42 = vld [vmem:[%s3728_s3 + $0x180] sm:$0xff] }
 0x43a   : > { %1706 = vmatpush1.msra.mxu0 %v1353_v17  ;;  %v1809_v17 = vld [vmem:[%s3728_s3 + $0x178] sm:$0xff] }
 0x43b   : > { %1707 = vmatprep.subr.mxu0 %v1322_v30  ;;  %v1525_v31 = vpop.permute.xlu1 %1524  ;;  %v1806_v30 = vld [vmem:[%s3728_s3 + $0x160] sm:$0xff] }
 0x43c   : > { %1708 = vmatpush1.msra.mxu0 %v1321_v36  ;;  %v1542_v45 = vsel %vm527_vm7, %v1525_v31, %v3459_v14  ;;  %v1803_v36 = vld [vmem:[%s3728_s3 + $0x148] sm:$0xff]  ;;  %v1848_v31 = vld [vmem:[%s3728_s3 + $0x2b0] sm:$0xff] }
 0x43d   : > { %v1575_v11 = vpop.permute.xlu0 %1574  ;;  %1709 = vmatprep.subr.mxu0 %v1320_v8  ;;  %v1800_v8 = vld [vmem:[%s3728_s3 + $0x130] sm:$0xff] }
 0x43e   : > { %1710 = vmatpush1.msra.mxu0 %v1319_v39  ;;  %v1583_v18 = vsel %vm564_vm6, %v1575_v11, %v2303_v41  ;;  %v1582_v35 = vsel %vm564_vm6, %v3443_v56, %v1575_v11  ;;  %v1543_v56 = vsel %vm527_vm7, %v3459_v14, %v3464_v37  ;;  %v1845_v39 = vld [vmem:[%s3728_s3 + $0x298] sm:$0xff] }
 0x43f   : > { %1711 = vmatprep.subr.mxu0 %v1318_v58  ;;  %v2312_v0 = vpop.permute.xlu1 %2311  ;;  %v1797_v11 = vld [vmem:[%s3728_s3 + $0x118] sm:$0xff]  ;;  %v1598_v58 = vld [vmem:[%s3726_s1 + $0x70] sm:$0xff] }
 0x440   : > { %1712 = vmatpush1.msra.mxu0 %v1317_v44  ;;  %v2314_v55 = vunpack.i.h.bf16 %v2312_v0  ;;  %v2313_v7 = vunpack.i.l.bf16 %v2312_v0  ;;  %v1599_v41 = vld [vmem:[%s3726_s1 + $0x78] sm:$0xff]  ;;  %v1842_v44 = vld [vmem:[%s3728_s3 + $0x280] sm:$0xff] }
 0x441   : > { %v1493_v19 = vpop.permute.xlu0 %1492  ;;  %1723 = vmatprep.subr.mxu0 %v1583_v18  ;;  %v1794_v0 = vld [vmem:[%s3728_s3 + $0x100] sm:$0xff]  ;;  %v1791_v18 = vld [vmem:[%s3728_s3 + $0xe8] sm:$0xff] }
 0x442   : > { %1724 = vmatpush2.msra.mxu0 %v1582_v35  ;;  %v1836_v35 = vld [vmem:[%s3728_s3 + $0x250] sm:$0xff] }
 0x443   : > { %1725 = vmatprep.subr.mxu0 %v1581_v38  ;;  %v1497_v48 = vpop.permute.xlu1 %1496  ;;  %v1833_v38 = vld [vmem:[%s3728_s3 + $0x238] sm:$0xff] }
 0x444   : > { %1726 = vmatpush2.msra.mxu0 %v1580_v22  ;;  %v1509_v4 = vsel %vm490_vm8, %v1497_v48, %v2314_v55  ;;  %v1508_v62 = vsel %vm490_vm8, %v1495_v61, %v1497_v48  ;;  %v1854_v61 = vld [vmem:[%s3728_s3 + $0x2e0] sm:$0xff]  ;;  %v1785_v22 = vld [vmem:[%s3728_s3 + $0xb8] sm:$0xff] }
 0x445   : > { %v1539_v43 = vpop.permute.xlu0 %1538  ;;  %1727 = vmatprep.subr.mxu0 %v1579_v20  ;;  %v1830_v48 = vld [vmem:[%s3728_s3 + $0x220] sm:$0xff]  ;;  %v1827_v20 = vld [vmem:[%s3728_s3 + $0x208] sm:$0xff] }
 0x446   : > { %v1546_v10 = vsel %vm527_vm7, %v3454_v9, %v1539_v43  ;;  %1728 = vmatpush2.msra.mxu0 %v1578_v49  ;;  %v1547_v40 = vsel %vm527_vm7, %v1539_v43, %v2308_v57  ;;  %v1782_v57 = vld [vmem:[%s3728_s3 + $0xa0] sm:$0xff]  ;;  %v1779_v49 = vld [vmem:[%s3728_s3 + $0x88] sm:$0xff]  ;;  %v1824_v43 = vld [vmem:[%s3728_s3 + $0x1f0] sm:$0xff] }
 0x447   : > { %1729 = vmatprep.subr.mxu0 %v1547_v40  ;;  %v1491_v54 = vpop.permute.xlu1 %1490 }
 0x448   : > { %1730 = vmatpush2.msra.mxu0 %v1546_v10  ;;  %v1507_v12 = vsel %vm490_vm8, %v1491_v54, %v1493_v19  ;;  %v1788_v19 = vld [vmem:[%s3728_s3 + $0xd0] sm:$0xff] }
 0x449   : > { %v1503_v50 = vpop.permute.xlu0 %1502  ;;  %1731 = vmatprep.subr.mxu0 %v1545_v1 }
 0x44a   : > { %1732 = vmatpush2.msra.mxu0 %v1544_v6  ;;  %v1511_v63 = vsel %vm490_vm8, %v1503_v50, %v2313_v7  ;;  %v1510_v23 = vsel %vm490_vm8, %v3476_v47, %v1503_v50  ;;  %v1816_v47 = vld [vmem:[%s3728_s3 + $0x1b0] sm:$0xff]  ;;  %v1821_v7 = vld [vmem:[%s3728_s3 + $0x1d8] sm:$0xff] }
 0x44b   : > { %1733 = vmatprep.subr.mxu0 %v1543_v56  ;;  %v1489_v60 = vpop.permute.xlu1 %1488  ;;  %1931 = vmatpush2.msra.mxu1 %v1816_v47  ;;  %v1601_v56 = vld [vmem:[%s3726_s1 + $0x88] sm:$0xff] }
 0x44c   : > { %1734 = vmatpush2.msra.mxu0 %v1542_v45  ;;  %v1506_v13 = vsel %vm490_vm8, %v1489_v60, %v1491_v54  ;;  %1932 = vmatprep.subr.mxu1 %v1814_v32  ;;  %v1773_v45 = vld [vmem:[%s3728_s3 + $0x58] sm:$0xff]  ;;  %v1600_v60 = vld [vmem:[%s3726_s1 + $0x80] sm:$0xff]  ;;  %v1860_v32 = vld [vmem:[%s3727_s2 + $0x91] ss:$0 sm:$0xff] }
 0x44d   : > { %v1465_v2 = vpop.permute.xlu0 %1464  ;;  %1735 = vmatprep.subr.mxu0 %v1511_v63  ;;  %1933 = vmatpush2.msra.mxu1 %v1813_v46  ;;  %v1818_v63 = vld [vmem:[%s3728_s3 + $0x1c0] sm:$0xff] }
 0x44e   : > { %1736 = vmatpush2.msra.mxu0 %v1510_v23  ;;  %1934 = vmatprep.subr.mxu1 %v1811_v51  ;;  %v1770_v23 = vld [vmem:[%s3728_s3 + $0x40] sm:$0xff] }
 0x44f   : > { %v2317_v21 = vpop.permute.xlu1 %2316  ;;  %1737 = vmatprep.subr.mxu0 %v1509_v4  ;;  %1935 = vmatpush2.msra.mxu1 %v1810_v42  ;;  %v1767_v4 = vld [vmem:[%s3728_s3 + $0x28] sm:$0xff] }
 0x450   : > { %v2319_v9 = vunpack.i.h.bf16 %v2317_v21  ;;  %v2318_v59 = vunpack.i.l.bf16 %v2317_v21  ;;  %1738 = vmatpush2.msra.mxu0 %v1508_v62  ;;  %v1812_v62 = vld [vmem:[%s3728_s3 + $0x190] sm:$0xff] }
 0x451   : > { %v1467_v14 = vpop.permute.xlu0 %1466  ;;  %1739 = vmatprep.subr.mxu0 %v1507_v12  ;;  %v1764_v21 = vld [vmem:[%s3728_s3 + $0x10] sm:$0xff]  ;;  %v1863_v12 = vshrl.u32 %v244_v25, 7 }
 0x452   : > { %v1474_v28 = vsel %vm453_vm0, %v1465_v2, %v1467_v14  ;;  %1740 = vmatpush2.msra.mxu0 %v1506_v13  ;;  %v1475_v24 = vsel %vm453_vm0, %v1467_v14, %v2318_v59  ;;  %v1815_v2 = vld [vmem:[%s3728_s3 + $0x1a8] sm:$0xff]  ;;  %v2107_v14 = vld [vmem:[%s3727_s2 + $0x90] ss:$8 sm:$0x3] }
 0x453   : > { %v1461_v37 = vpop.permute.xlu1 %1460  ;;  %1741 = vmatprep.subr.mxu0 %v1475_v24  ;;  %v1864_v13 = vsub.s32 0, %v1863_v12 }
 0x454   : > { %1742 = vmatpush2.msra.mxu0 %v1474_v28  ;;  %v1473_v16 = vsel %vm453_vm0, %v1461_v37, %v2319_v9  ;;  %v1868_v28 = vsub.s32 1, %v1863_v12 }
 0x455   : > { %v1459_v52 = vpop.permute.xlu0 %1458  ;;  %1743 = vmatprep.subr.mxu0 %v1473_v16  ;;  %v1865_v24 = vrot.slane %v2107_v14, %v1864_v13 }
 0x456   : > { %v1472_v33 = vsel %vm453_vm0, %v1459_v52, %v1461_v37  ;;  %v1869_v37 = vrot.slane %v2107_v14, %v1868_v28 }
 0x457   : > { %1744 = vmatpush2.msra.mxu0 %v1472_v33 }
 0x458   : > { %1746 = vmatmul.mubr.f32.vlgmr.msra.gmra.mxu0 %v1596_v26  ;;  %2112 = vmatprep.subr.mxu0 %v1857_v29 }
 0x459   : > { %2113 = vmatpush3.msra.mxu0 %v1809_v17  ;;  %2105 = vmatprep.mubr.msk.f32.mxu0 %vm661_vm1, %v1599_v41 }
 0x45a   : > { %2114 = vmatprep.subr.mxu0 %v1854_v61 }
 0x45b   : > { %2115 = vmatpush3.msra.mxu0 %v1806_v30 }
 0x45c   : > { %2116 = vmatprep.subr.mxu0 %v1851_v3  ;;  %1752 = vmatmul.mubr.f32.gmra.mxu0 %v1598_v58 }
 0x45d   : > { %2117 = vmatpush3.msra.mxu0 %v1803_v36  ;;  %2106 = vmatprep.mubr.msk.f32.mxu0 %vm661_vm1, %v1601_v56 }
 0x45e   : > { %2118 = vmatprep.subr.mxu0 %v1848_v31 }
 0x45f   : > { %2119 = vmatpush3.msra.mxu0 %v1800_v8 }
 0x460   : > { %2120 = vmatprep.subr.mxu0 %v1845_v39  ;;  %v1662_v40 = vpop.permute.xlu1 %1661  ;;  %1756 = vmatmul.mubr.f32.gmra.mxu0 %v1600_v60 }
 0x461   : > { %2121 = vmatpush3.msra.mxu0 %v1797_v11 }
 0x462   : > { %2122 = vmatprep.subr.mxu0 %v1842_v44 }
 0x463   : > { %2123 = vmatpush3.msra.mxu0 %v1794_v0 }
 0x464   : > { %2124 = vmatprep.subr.mxu0 %v1839_v34 }
 0x465   : > { %2125 = vmatpush3.msra.mxu0 %v1791_v18 }
 0x466   : > { %2126 = vmatprep.subr.mxu0 %v1836_v35 }
 0x467   : > { %2127 = vmatpush3.msra.mxu0 %v1788_v19 }
 0x468   : > { %2128 = vmatprep.subr.mxu0 %v1833_v38 }
 0x469   : > { %2129 = vmatpush3.msra.mxu0 %v1785_v22 }
 0x46a   : > { %2130 = vmatprep.subr.mxu0 %v1830_v48 }
 0x46b   : > { %2131 = vmatpush3.msra.mxu0 %v1782_v57 }
 0x46c   : > { %2132 = vmatprep.subr.mxu0 %v1827_v20 }
 0x46d   : > { %2133 = vmatpush3.msra.mxu0 %v1779_v49 }
 0x46e   : > { %2134 = vmatprep.subr.mxu0 %v1824_v43 }
 0x46f   : > { %2135 = vmatpush3.msra.mxu0 %v1776_v53 }
 0x470   : > { %2136 = vmatprep.subr.mxu0 %v1821_v7 }
 0x471   : > { %2137 = vmatpush3.msra.mxu0 %v1773_v45 }
 0x472   : > { %2138 = vmatprep.subr.mxu0 %v1818_v63 }
 0x473   : > { %2139 = vmatpush3.msra.mxu0 %v1770_v23 }
 0x474   : > { %2140 = vmatprep.subr.mxu0 %v1815_v2 }
 0x475   : > { %2141 = vmatpush3.msra.mxu0 %v1767_v4 }
 0x476   : > { %2142 = vmatprep.subr.mxu0 %v1812_v62 }
 0x477   : > { %2143 = vmatpush3.msra.mxu0 %v1764_v21 }
 0x518   : > { %v1747_v10 = vpop.f32.mrf.mxu0 }
 0x519   : > { %v1748_v54 = vadd.f32 %v1747_v10, %v1662_v40 }
 0x51a   : > { %v1749_v1 = vpop.f32.mrf.mxu0 }
 0x51b   : > { %v1750_v6 = vadd.f32 %v1749_v1, %v1662_v40  ;;  %v1760_v55 = vmax.f32 %v1748_v54, 0.0 }
 0x51c   : > { %v1753_v9 = vpop.f32.mrf.mxu0 }
 0x51d   : > { %v1761_v50 = vmax.f32 %v1750_v6, 0.0 }
 0x51e   : > { %v1754_v59 = vpop.f32.mrf.mxu0 }
 0x51f   : > { %1936 = vmatprep.mubr.f32.mxu1 %v1761_v50 }
 0x520   : > { %1937 = vmatmul.mubr.f32.vlgmr.msra.gmra.mxu1 %v1760_v55  ;;  %v1757_v25 = vpop.f32.mrf.mxu0 }
 0x522   : > { %v1758_v15 = vpop.f32.mrf.mxu0 }
 0x5e0   : > { %v1938_v16 = vpop.f32.mrf.mxu1 }
 0x5e1   : > { %v1939_v52 = vadd.f32 %v1938_v16, %v1865_v24 }
 0x5e2   : > { %v1940_v26 = vpop.f32.mrf.mxu1 }
 0x5e3   : > { %v1941_v33 = vadd.f32 %v1940_v26, %v1869_v37  ;;  %v1943_v5 = vmax.f32 %v1939_v52, 0.0 }
 0x5e5   : > { %v1944_v27 = vmax.f32 %v1941_v33, 0.0 }
 0x5e7   : > { %2009 = vmatprep.mubr.f32.mxu0 %v1944_v27 }
 0x5e8   : > { %2010 = vmatmul.mubr.f32.vlgmr.msra.gmra.mxu0 %v1943_v5 }
 0x6a8   : > { %v2144_v47 = vpop.f32.mrf.mxu0 }
 0x6aa   : > { %v2145_v46 = vpop.f32.mrf.mxu0 }
 0x6ab   : > { %v2146_v51 = vadd.f32 %v2145_v46, %v2144_v47 }
 0x6ad   : > { %v2012_v42 = vadd.f32 %v2146_v51, %v1860_v32 }
 0x6af   : > { %v2015_v29 = vmax.f32 %v2012_v42, 0.0 }
 0x6b1   : > { %2017 = vst.msk [vmem:[%s224_s22] sm:$0x1] %vm2016_vm15, %v2015_v29 }
 0x6b2   : > { %2333 = shalt.err (!%p2330_p5)
}
 0x6b3   : > { %s2334_s29 = scalar_lea.hbm %s2029_s6, 16  ;;  %s2338_s5 = scalar_lea.hbm %s3729_s4, 32 }
 0x6b4   : > { %p2335_p7 = scmp.ne.s32.totalorder %s2029_s6, %s2334_s29  ;;  %p2339_p12 = scmp.lt.s32.totalorder %s2029_s6, %s3729_s4 }
 0x6b5   : > { %p2340_p13 = scmp.lt.s32.totalorder %s2338_s5, %s2334_s29 }
 0x6b6   : > { %p2336_p10 = pnand %p2335_p7, %p2456_p6 }
 0x6b7   : > { %p2341_p0 = por %p2340_p13, %p2339_p12 }
 0x6b8   : > { %p2337_p11 = pneg %p2336_p10 }
 0x6ba   : > { %p2342_p9 = pnand %p2341_p0, %p2337_p11 }
 0x6bc   : > { %2345 = shalt.err (!%p2342_p9)
}
 0x6bd   : > { %2149 = dma.vmem_to_hbm [thread:$0]  (%p2456_p6), %s2032_s9, 16, %s2029_s6, %s2019_s7  }
 0x6be PF: > { %s2043_s14 = sand.u32 1, %s2368_s15   ;;  %p3733_p1 = scmp.ge.s32.totalorder %s2380_s18, 2 }
 0x6bf   : > { %s2044_s20 = scalar_lea.sflag [#allocation6], %s2043_s14 }
 0x6c0   : > { %p2152_p2 = pnand %p3733_p1, %p2460_p8 }
 0x6c2   : > { %p2153_p3 = pneg %p2152_p2 }
 0x6c4   : > { %2363 = dma.done.wait (%p2153_p3), %s2044_s20, 16  }
 0x6c5   : > { %2365 = vsyncadd (%p2153_p3), %s2044_s20, 4294967280  ;;  %p14_p9 = scmp.ge.s32.totalorder %s2441_s21, 4   ;;  %s3734_s15 = smov %s2372_s16 }
 0x6c6   : > { %s3735_s16 = smov %s2376_s17  ;;  %s3736_s17 = smov %s2454_s24 }
 0x6c7   : > { %s3737_s18 = smov %s2441_s21  ;;  %16 = sbr.rel (!%p14_p9) target bundleno = 3 (0x3), region = 100 }
 0x6cc   :  { %2048 = vsyncpa [#allocation6], 1 }
 0x6cd   :  { %2050 = vsyncpa [#allocation6 + $0x1], 1 }

</bundles_post_ra>
